<compile_context>
chip_gen: v5e
topology: v5e:2x2
jax: 0.10.0
libtpu: 0.0.40
codegen_flags: <defaults>
</compile_context>

<pallas_src>
import functools

import jax
import jax.numpy as jnp
from jax import lax
from jax.experimental import pallas as pl
from jax.experimental.pallas import tpu as pltpu


def _round_up(x, m):
    return (x + m - 1) // m * m


def _concat_attn_kernel(enc_ref, c_ref, u_ref, out_ref, *, t_valid, t_tile):
    """One (batch-block i, time-tile k) grid step.

    enc_ref: (tT, bb, H)  time-major encoder tile (streamed from HBM)
    c_ref:   (bb, 1)      fused hidden/bias contribution  v.(W1^T h_b) + v.b
    u_ref:   (1, H)       fused encoder projection vector W2^T v
    out_ref: (bb, Tp)     lane-dense score slab; VMEM-resident across k
                          (same block index for every k); normalised in place
                          at the final k step.
    """
    k = pl.program_id(1)

    # --- raw scores for this T tile: score[b, t] = enc[t, b, :] . u + c_b ---
    enc = enc_ref[...]                          # [tT, bb, H]
    u = u_ref[...]                              # [1, H] (broadcast over tT,bb)
    s_tb = jnp.sum(enc * u, axis=-1)            # [tT, bb]  VPU mul + lane sum
    s = s_tb.T + c_ref[...]                     # [bb, tT]  small XLU transpose

    start = pl.multiple_of(k * t_tile, t_tile)
    out_ref[:, pl.ds(start, t_tile)] = s        # aligned, unmasked lane stores

    # --- final k step: masked, numerically-stable softmax over T (lanes) ---
    @pl.when(k == pl.num_programs(1) - 1)
    def _():
        scores = out_ref[...]                   # [bb, Tp]
        col = lax.broadcasted_iota(jnp.int32, scores.shape, 1)
        scores = jnp.where(col < t_valid, scores, -jnp.inf)  # mask T padding
        m = jnp.max(scores, axis=-1, keepdims=True)
        p = jnp.exp(scores - m)
        l = jnp.sum(p, axis=-1, keepdims=True)
        # EUP approximate reciprocal + one Newton step -> exact to ~f32 eps^2.
        r = pl.reciprocal(l, approx=True)
        r = r * (2.0 - l * r)
        out_ref[...] = p * r


def _pick_tiles(B, T, H, *, block_b=None, block_t=None,
                vmem_budget_bytes=10 * 1024 * 1024):
    """Pick (bb, tT, Tp, est_bytes).

    bb: batch block — full sublanes (multiple of 8) when possible and >= 2
        blocks so the "parallel" axis can span both v7x TensorCores.
    tT: T tile — multiple of 128 dividing Tp, as large as the VMEM budget
        allows (>= ~512 KiB blocks amortize the ~0.35 us per-step overhead).
    Budget counts the padded lane width of H (128) and the enc*u temporary,
    so the default fits every generation's scoped-VMEM default.
    """
    Hp = _round_up(H, 128)          # lane padding of the H axis
    Tp = _round_up(T, 128)          # lane-dense output width

    if block_b is not None:
        assert B % block_b == 0, "block_b must divide B"
        bb_cands = [block_b]
    elif B % 8 == 0:
        cands = [c for c in (128, 64, 32, 16, 8) if B % c == 0]
        multi = [c for c in cands if B // c >= 2]     # keep both TCs busy
        bb_cands = multi if multi else cands
    else:
        bb_cands = [B]              # full-dim fallback (odd / tiny B)

    if block_t is not None:
        assert block_t % 128 == 0 and Tp % block_t == 0
        t_cands = [block_t]
    else:
        t_cands = [c for c in (4096, 2048, 1024, 512, 256, 128) if Tp % c == 0]

    def footprint(bb, tt):
        bbp = _round_up(bb, 8)
        enc_buf = tt * bbp * Hp * 4         # one enc input buffer
        prod = tt * bbp * Hp * 4            # enc*u temporary (worst case)
        out_buf = bbp * Tp * 4              # resident score slab
        return 2 * enc_buf + prod + 2 * out_buf

    bb, tt = bb_cands[-1], t_cands[-1]      # smallest config as fallback
    found = False
    for t_c in t_cands:                     # prefer the largest T tile
        for b_c in bb_cands:
            if footprint(b_c, t_c) <= vmem_budget_bytes:
                bb, tt = b_c, t_c
                found = True
                break
        if found:
            break
    return bb, tt, Tp, footprint(bb, tt)


def prepare_concat_attn_params(W, b, v):
    """Fold (W, b, v) into the fused vectors the kernel consumes.

    Call once per set of weights (hoisted out of the per-call path):
      score[b, t] = enc[t, b, :] . u  +  hidden_b . w1v  +  vb
    """
    H = W.shape[0]
    u = jnp.dot(v, W[:, H:]).reshape(1, H).astype(jnp.float32)   # W2^T v
    w1v = jnp.dot(v, W[:, :H]).astype(jnp.float32)               # W1^T v
    vb = jnp.dot(v, b).astype(jnp.float32)                       # v . bias
    return u, w1v, vb


def concat_attn_apply(hidden, encoder_output, params, *,
                      block_b=None, block_t=None, enc_buffer_count=2,
                      vmem_budget_bytes=10 * 1024 * 1024):
    """hidden: [1,B,H], encoder_output: [T,B,H], params from
    prepare_concat_attn_params  ->  [B, 1, T] softmax attention weights."""
    u, w1v, vb = params
    T, B, H = encoder_output.shape

    # Per-call fused hidden/bias contribution (tiny GEMV: B*H flops).
    c = (hidden[0].astype(jnp.float32) @ w1v + vb).reshape(B, 1)

    bb, tt, Tp, est_bytes = _pick_tiles(
        B, T, H, block_b=block_b, block_t=block_t,
        vmem_budget_bytes=vmem_budget_bytes)
    grid_b = B // bb
    grid_t = Tp // tt

    enc = encoder_output
    if Tp != T:
        # Zero-pad T to a multiple of 128 (full tiles, lane-dense output).
        # Padded columns are masked to -inf inside the kernel.  No-op when T
        # is already a multiple of 128 (the common production case).
        enc = jnp.pad(enc, ((0, Tp - T), (0, 0), (0, 0)))

    kernel = functools.partial(_concat_attn_kernel, t_valid=T, t_tile=tt)

    enc_spec_kwargs = {}
    if enc_buffer_count != 2:
        # v7x: worth sweeping Buffered(3) — the kernel is pure DMA at 3.2 TB/s.
        enc_spec_kwargs["pipeline_mode"] = pl.Buffered(enc_buffer_count)

    vmem_limit = None
    if est_bytes > vmem_budget_bytes:
        # Huge-H configs that cannot meet the conservative budget: raise the
        # scoped limit explicitly, staying well under v7x's 64 MiB physical.
        vmem_limit = min(_round_up(int(est_bytes * 1.25), 1 << 20), 48 << 20)

    out2d = pl.pallas_call(
        kernel,
        out_shape=jax.ShapeDtypeStruct((B, Tp), jnp.float32),
        grid_spec=pltpu.PrefetchScalarGridSpec(
            num_scalar_prefetch=0,
            grid=(grid_b, grid_t),
            in_specs=[
                # encoder stays time-major in HBM; tile over (T, batch).
                pl.BlockSpec((tt, bb, H), lambda i, k: (k, i, 0),
                             **enc_spec_kwargs),
                pl.BlockSpec((bb, 1), lambda i, k: (i, 0)),
                pl.BlockSpec((1, H), lambda i, k: (0, 0)),
            ],
            # Same block for every k: the [bb, Tp] score slab stays
            # VMEM-resident across the softmax-reduction (T) axis.
            out_specs=pl.BlockSpec((bb, Tp), lambda i, k: (i, 0)),
        ),
        compiler_params=pltpu.CompilerParams(
            dimension_semantics=("parallel", "arbitrary"),
            vmem_limit_bytes=vmem_limit),
    )(enc, c, u)

    return out2d[:, :T].reshape(B, 1, T)


def concat_attn(hidden, encoder_output, W, b, v, **kwargs):
    """Convenience wrapper: W: [H, 2H] (PyTorch Linear weight), b: [H], v: [H]."""
    params = prepare_concat_attn_params(W, b, v)
    return concat_attn_apply(hidden, encoder_output, params, **kwargs)


def _reference(hidden, encoder_output, W, b, v):
    T, B, H = encoder_output.shape
    h_rep = jnp.broadcast_to(hidden, (T, B, H)).transpose(1, 0, 2)   # [B, T, H]
    enc = encoder_output.transpose(1, 0, 2)                          # [B, T, H]
    cat = jnp.concatenate([h_rep, enc], axis=2)                      # [B, T, 2H]
    energy = cat @ W.T + b                                           # [B, T, H]
    score = jnp.einsum("h,bth->bt", v, energy)[:, None, :]           # [B, 1, T]
    return jax.nn.softmax(score, axis=2)


if __name__ == "__main__":
    B, T, H = 2, 8, 32
    key = jax.random.PRNGKey(0)
    k_h, k_e, k_w, k_b, k_v = jax.random.split(key, 5)

    hidden = jax.random.normal(k_h, (1, B, H), dtype=jnp.float32)
    encoder_output = jax.random.normal(k_e, (T, B, H), dtype=jnp.float32)

    # Deterministic parameter init mimicking PyTorch defaults:
    #   Linear(2H, H): U(-1/sqrt(2H), 1/sqrt(2H));  v: U(-1/sqrt(H), 1/sqrt(H))
    lin_bound = 1.0 / jnp.sqrt(jnp.float32(2 * H))
    v_bound = 1.0 / jnp.sqrt(jnp.float32(H))
    W = jax.random.uniform(k_w, (H, 2 * H), jnp.float32, -lin_bound, lin_bound)
    b = jax.random.uniform(k_b, (H,), jnp.float32, -lin_bound, lin_bound)
    v = jax.random.uniform(k_v, (H,), jnp.float32, -v_bound, v_bound)

    out = concat_attn(hidden, encoder_output, W, b, v)
    out = jax.block_until_ready(out)

    ref = _reference(hidden, encoder_output, W, b, v)
    assert out.shape == (B, 1, T)
    assert jnp.allclose(out, ref, atol=1e-5, rtol=1e-5), "mismatch vs reference"

    print("KERNEL_OK")
</pallas_src>

<mosaic_0001>
module attributes {stable_mosaic.version = 11 : i64} {
  func.func @_concat_attn_kernel(%arg0: i32, %arg1: i32, %arg2: memref<128x2x32xf32, #tpu.memory_space<vmem>>, %arg3: memref<2x1xf32, #tpu.memory_space<vmem>>, %arg4: memref<1x32xf32, #tpu.memory_space<vmem>>, %arg5: memref<2x128xf32, #tpu.memory_space<vmem>>) attributes {dimension_semantics = [#tpu.dimension_semantics<parallel>, #tpu.dimension_semantics<arbitrary>], iteration_bounds = array<i64: 1, 1>, scalar_prefetch = 0 : i64, scratch_operands = 0 : i64, tpu.core_type = #tpu.core_type<tc>, window_params = [{transform_indices = @transform_0, window_bounds = array<i64: 128, 2, 32>}, {transform_indices = @transform_1, window_bounds = array<i64: 2, 1>}, {pipeline_mode = #tpu.pipeline_mode<synchronous>, transform_indices = @transform_2, window_bounds = array<i64: 1, 32>}, {transform_indices = @transform_3, window_bounds = array<i64: 2, 128>}]} {
    %c0 = arith.constant 0 : index
    %c0_0 = arith.constant 0 : index
    %c0_1 = arith.constant 0 : index
    %0 = vector.load %arg2[%c0, %c0_0, %c0_1] : memref<128x2x32xf32, #tpu.memory_space<vmem>>, vector<128x2x32xf32>
    %c0_2 = arith.constant 0 : index
    %c0_3 = arith.constant 0 : index
    %1 = vector.load %arg4[%c0_2, %c0_3] : memref<1x32xf32, #tpu.memory_space<vmem>>, vector<1x32xf32>
    %2 = vector.shape_cast %1 : vector<1x32xf32> to vector<1x1x32xf32>
    %3 = vector.broadcast %2 : vector<1x1x32xf32> to vector<128x2x32xf32>
    %4 = arith.mulf %0, %3 : vector<128x2x32xf32>
    %cst = arith.constant dense<0.000000e+00> : vector<128x2xf32>
    %5 = vector.multi_reduction <add>, %4, %cst [2] : vector<128x2x32xf32> to vector<128x2xf32>
    %6 = tpu.transpose %5, [1, 0] : vector<128x2xf32> -> vector<2x128xf32>
    %c0_4 = arith.constant 0 : index
    %c0_5 = arith.constant 0 : index
    %7 = vector.load %arg3[%c0_4, %c0_5] : memref<2x1xf32, #tpu.memory_space<vmem>>, vector<2x1xf32>
    %8 = vector.broadcast %7 : vector<2x1xf32> to vector<2x128xf32>
    %9 = arith.addf %6, %8 : vector<2x128xf32>
    %c128_i32 = arith.constant 128 : i32
    %10 = arith.muli %arg1, %c128_i32 : i32
    %11 = tpu.assume_multiple %10, 128 : i32
    %c0_6 = arith.constant 0 : index
    %12 = arith.index_cast %11 : i32 to index
    %13 = vector.load %arg5[%c0_6, %12] : memref<2x128xf32, #tpu.memory_space<vmem>>, vector<2x128xf32>
    tpu.vector_store %arg5[%c0_6, %12], %9 {strides = array<i32>} : memref<2x128xf32, #tpu.memory_space<vmem>>, vector<2x128xf32>,
    %c0_i32 = arith.constant 0 : i32
    %14 = arith.cmpi eq, %arg1, %c0_i32 : i32
    %15 = arith.extui %14 : i1 to i32
    %c0_i32_7 = arith.constant 0 : i32
    %16 = arith.cmpi ne, %15, %c0_i32_7 : i32
    scf.if %16 {
      %c0_8 = arith.constant 0 : index
      %c0_9 = arith.constant 0 : index
      %17 = vector.load %arg5[%c0_8, %c0_9] : memref<2x128xf32, #tpu.memory_space<vmem>>, vector<2x128xf32>
      %18 = tpu.iota {dimensions = array<i32: 1>} : vector<2x128xi32>
      %c8_i32 = arith.constant 8 : i32
      %19 = vector.broadcast %c8_i32 : i32 to vector<2x128xi32>
      %20 = arith.cmpi slt, %18, %19 : vector<2x128xi32>
      %cst_10 = arith.constant 0xFF800000 : f32
      %21 = vector.broadcast %cst_10 : f32 to vector<2x128xf32>
      %22 = arith.select %20, %17, %21 : vector<2x128xi1>, vector<2x128xf32>
      %cst_11 = arith.constant dense<0xFF800000> : vector<2xf32>
      %23 = vector.multi_reduction <maximumf>, %22, %cst_11 [1] : vector<2x128xf32> to vector<2xf32>
      %24 = vector.shape_cast %23 : vector<2xf32> to vector<2x1xf32>
      %25 = vector.broadcast %24 : vector<2x1xf32> to vector<2x128xf32>
      %26 = arith.subf %22, %25 : vector<2x128xf32>
      %27 = math.exp %26 : vector<2x128xf32>
      %cst_12 = arith.constant dense<0.000000e+00> : vector<2xf32>
      %28 = vector.multi_reduction <add>, %27, %cst_12 [1] : vector<2x128xf32> to vector<2xf32>
      %29 = vector.shape_cast %28 : vector<2xf32> to vector<2x1xf32>
      %30 = tpu.reciprocal %29 {approx = true} : vector<2x1xf32> -> vector<2x1xf32>
      %31 = arith.mulf %29, %30 : vector<2x1xf32>
      %cst_13 = arith.constant 2.000000e+00 : f32
      %32 = vector.broadcast %cst_13 : f32 to vector<2x1xf32>
      %33 = arith.subf %32, %31 : vector<2x1xf32>
      %34 = arith.mulf %30, %33 : vector<2x1xf32>
      %35 = vector.broadcast %34 : vector<2x1xf32> to vector<2x128xf32>
      %36 = arith.mulf %27, %35 : vector<2x128xf32>
      %c0_14 = arith.constant 0 : index
      %c0_15 = arith.constant 0 : index
      %37 = vector.load %arg5[%c0_14, %c0_15] : memref<2x128xf32, #tpu.memory_space<vmem>>, vector<2x128xf32>
      tpu.vector_store %arg5[%c0_14, %c0_15], %36 {strides = array<i32>} : memref<2x128xf32, #tpu.memory_space<vmem>>, vector<2x128xf32>,
    } else {
    }
    return
  }
  func.func @transform_0(%arg0: i32, %arg1: i32) -> (i32, i32, i32) {
    %c0_i32 = arith.constant 0 : i32
    %c0_i32_0 = arith.constant 0 : i32
    return %arg1, %arg0, %c0_i32 : i32, i32, i32
  }
  func.func @transform_1(%arg0: i32, %arg1: i32) -> (i32, i32) {
    %c0_i32 = arith.constant 0 : i32
    %c0_i32_0 = arith.constant 0 : i32
    return %arg0, %c0_i32 : i32, i32
  }
  func.func @transform_2(%arg0: i32, %arg1: i32) -> (i32, i32) {
    %c0_i32 = arith.constant 0 : i32
    %c0_i32_0 = arith.constant 0 : i32
    %c0_i32_1 = arith.constant 0 : i32
    return %c0_i32, %c0_i32_0 : i32, i32
  }
  func.func @transform_3(%arg0: i32, %arg1: i32) -> (i32, i32) {
    %c0_i32 = arith.constant 0 : i32
    %c0_i32_0 = arith.constant 0 : i32
    return %arg0, %c0_i32 : i32, i32
  }
}

</mosaic_0001>

<bundles_post_ra>
// kernel: tpu_custom_call.1
= control target key start
LH: loop header
LB: loop body
LE: loop exit
PB: predicated region body
PF: predicated region fallthrough
CT: control target
= control target key end

     0   :  { %vm275_vm0 = vcmask 254976   ;;  %s2171_s0 = inlined_call_operand.vmem [shape: f32[128,2,32], index: 0, kind: input, shape index: {}]   ;;  %s2172_s1 = inlined_call_operand.vmem [shape: f32[2,1], index: 1, kind: input, shape index: {}]   ;;  %s2173_s2 = inlined_call_operand.vmem [shape: f32[1,32], index: 2, kind: input, shape index: {}]   ;;  %s2174_s3 = inlined_call_operand.hbm [shape: f32[2,128], index: 3, kind: output, shape index: {}]  }
   0x1   :  { %v19_v0 = vld [vmem:[%s2171_s0 + $0x8] sm:$0x3]  ;;  %v1201_v1 = vld [vmem:[%s2173_s2] ss:$0 sm:$0xff]  ;;  %v17_v2 = vld [vmem:[%s2171_s0 + $0x4] sm:$0x3] }
   0x2   :  { %v15_v3 = vld [vmem:[%s2171_s0] sm:$0x3]  ;;  %v151_v4 = vmul.f32 %v1201_v1, %v19_v0  ;;  %v149_v5 = vmul.f32 %v1201_v1, %v17_v2  ;;  %v20_v7 = vld [vmem:[%s2171_s0 + $0xa] sm:$0x3]  ;;  %v18_v8 = vld [vmem:[%s2171_s0 + $0x6] sm:$0x3] }
   0x3   :  { %v147_v6 = vmul.f32 %v1201_v1, %v15_v3  ;;  %v16_v12 = vld [vmem:[%s2171_s0 + $0x2] sm:$0x3]  ;;  %v152_v13 = vmul.f32 %v1201_v1, %v20_v7  ;;  %v150_v14 = vmul.f32 %v1201_v1, %v18_v8 }
   0x4   :  { %v288_v9 = vsel %vm275_vm0, %v151_v4, 0.0  ;;  %v282_v10 = vsel %vm275_vm0, %v149_v5, 0.0  ;;  %v148_v15 = vmul.f32 %v1201_v1, %v16_v12 }
   0x5   :  { %v276_v11 = vsel %vm275_vm0, %v147_v6, 0.0  ;;  %289 = vadd.xlane.f32.xlu2 %v288_v9  ;;  %283 = vadd.xlane.f32.xlu1 %v282_v10 }
   0x6   :  { %277 = vadd.xlane.f32.xlu0 %v276_v11 }
   0x7   :  { %8 = vsyncpa [#allocation3], 0  ;;  %v291_v16 = vsel %vm275_vm0, %v152_v13, 0.0  ;;  %v285_v17 = vsel %vm275_vm0, %v150_v14, 0.0  ;;  %v279_v18 = vsel %vm275_vm0, %v148_v15, 0.0  ;;  %vm918_vm1 = vcmask 1041409  }
   0x8   :  { %v23_v19 = vld [vmem:[%s2171_s0 + $0x10] sm:$0x3]  ;;  %v22_v20 = vld [vmem:[%s2171_s0 + $0xe] sm:$0x3]  ;;  %v21_v21 = vld [vmem:[%s2171_s0 + $0xc] sm:$0x3] }
   0x9   :  { %v155_v22 = vmul.f32 %v1201_v1, %v23_v19  ;;  %v154_v23 = vmul.f32 %v1201_v1, %v22_v20  ;;  %v153_v24 = vmul.f32 %v1201_v1, %v21_v21  ;;  %v26_v28 = vld [vmem:[%s2171_s0 + $0x16] sm:$0x3]  ;;  %v25_v29 = vld [vmem:[%s2171_s0 + $0x14] sm:$0x3]  ;;  %v24_v30 = vld [vmem:[%s2171_s0 + $0x12] sm:$0x3] }
   0xa   :  { %v158_v31 = vmul.f32 %v1201_v1, %v26_v28  ;;  %v157_v32 = vmul.f32 %v1201_v1, %v25_v29  ;;  %v156_v33 = vmul.f32 %v1201_v1, %v24_v30  ;;  %v29_v37 = vld [vmem:[%s2171_s0 + $0x1c] sm:$0x3]  ;;  %v28_v38 = vld [vmem:[%s2171_s0 + $0x1a] sm:$0x3]  ;;  %v27_v39 = vld [vmem:[%s2171_s0 + $0x18] sm:$0x3] }
   0xb   :  { %v300_v25 = vsel %vm275_vm0, %v155_v22, 0.0  ;;  %v297_v26 = vsel %vm275_vm0, %v154_v23, 0.0  ;;  %v294_v27 = vsel %vm275_vm0, %v153_v24, 0.0  ;;  %v161_v40 = vmul.f32 %v1201_v1, %v29_v37  ;;  %v32_v46 = vld [vmem:[%s2171_s0 + $0x22] sm:$0x3]  ;;  %s1127_s30 = sshll.u32 %s2174_s3, 4  ;;  %s1128_s30 = int_to_ptr.hbm [resolvable:$true] %s1127_s30 }
   0xc   :  { %v309_v34 = vsel %vm275_vm0, %v158_v31, 0.0  ;;  %v306_v35 = vsel %vm275_vm0, %v157_v32, 0.0  ;;  %v303_v36 = vsel %vm275_vm0, %v156_v33, 0.0  ;;  %v160_v41 = vmul.f32 %v1201_v1, %v28_v38  ;;  %v31_v47 = vld [vmem:[%s2171_s0 + $0x20] sm:$0x3] }
   0xd   :  { %292 = vadd.xlane.f32.xlu2 %v291_v16  ;;  %286 = vadd.xlane.f32.xlu1 %v285_v17  ;;  %v159_v42 = vmul.f32 %v1201_v1, %v27_v39  ;;  %v318_v43 = vsel %vm275_vm0, %v161_v40, 0.0  ;;  %v30_v48 = vld [vmem:[%s2171_s0 + $0x1e] sm:$0x3]  ;;  %v164_v49 = vmul.f32 %v1201_v1, %v32_v46  ;;  %v163_v50 = vmul.f32 %v1201_v1, %v31_v47  ;;  %v35_v55 = vld [vmem:[%s2171_s0 + $0x28] sm:$0x3] }
   0xe   :  { %280 = vadd.xlane.f32.xlu0 %v279_v18  ;;  %v315_v44 = vsel %vm275_vm0, %v160_v41, 0.0  ;;  %v162_v51 = vmul.f32 %v1201_v1, %v30_v48  ;;  %v34_v56 = vld [vmem:[%s2171_s0 + $0x26] sm:$0x3]  ;;  %v33_v57 = vld [vmem:[%s2171_s0 + $0x24] sm:$0x3]  ;;  %v167_v58 = vmul.f32 %v1201_v1, %v35_v55  ;;  %vm920_vm2 = vcmask 1042434  }
   0xf   :  { %v312_v45 = vsel %vm275_vm0, %v159_v42, 0.0  ;;  %v327_v52 = vsel %vm275_vm0, %v164_v49, 0.0  ;;  %v324_v53 = vsel %vm275_vm0, %v163_v50, 0.0  ;;  %v166_v59 = vmul.f32 %v1201_v1, %v34_v56  ;;  %v38_v0 = vld [vmem:[%s2171_s0 + $0x2e] sm:$0x3] }
  0x10   :  { %v321_v54 = vsel %vm275_vm0, %v162_v51, 0.0  ;;  %v165_v60 = vmul.f32 %v1201_v1, %v33_v57  ;;  %v336_v61 = vsel %vm275_vm0, %v167_v58, 0.0  ;;  %v37_v2 = vld [vmem:[%s2171_s0 + $0x2c] sm:$0x3]  ;;  %v36_v3 = vld [vmem:[%s2171_s0 + $0x2a] sm:$0x3]  ;;  %v170_v4 = vmul.f32 %v1201_v1, %v38_v0 }
  0x11   :  { %v333_v62 = vsel %vm275_vm0, %v166_v59, 0.0  ;;  %v169_v5 = vmul.f32 %v1201_v1, %v37_v2  ;;  %v168_v6 = vmul.f32 %v1201_v1, %v36_v3  ;;  %v41_v10 = vld [vmem:[%s2171_s0 + $0x34] sm:$0x3]  ;;  %v40_v11 = vld [vmem:[%s2171_s0 + $0x32] sm:$0x3]  ;;  %vm922_vm3 = vcmask 1043459  }
  0x12   :  { %v330_v63 = vsel %vm275_vm0, %v165_v60, 0.0  ;;  %v345_v7 = vsel %vm275_vm0, %v170_v4, 0.0  ;;  %v39_v12 = vld [vmem:[%s2171_s0 + $0x30] sm:$0x3]  ;;  %v173_v13 = vmul.f32 %v1201_v1, %v41_v10  ;;  %v172_v14 = vmul.f32 %v1201_v1, %v40_v11  ;;  %v44_v19 = vld [vmem:[%s2171_s0 + $0x3a] sm:$0x3] }
  0x13   :  { %v342_v8 = vsel %vm275_vm0, %v169_v5, 0.0  ;;  %v339_v9 = vsel %vm275_vm0, %v168_v6, 0.0  ;;  %v171_v15 = vmul.f32 %v1201_v1, %v39_v12  ;;  %v43_v20 = vld [vmem:[%s2171_s0 + $0x38] sm:$0x3]  ;;  %v42_v21 = vld [vmem:[%s2171_s0 + $0x36] sm:$0x3]  ;;  %v176_v22 = vmul.f32 %v1201_v1, %v44_v19 }
  0x14   :  { %v354_v16 = vsel %vm275_vm0, %v173_v13, 0.0  ;;  %v351_v17 = vsel %vm275_vm0, %v172_v14, 0.0  ;;  %v175_v23 = vmul.f32 %v1201_v1, %v43_v20  ;;  %v174_v24 = vmul.f32 %v1201_v1, %v42_v21  ;;  %v47_v28 = vld [vmem:[%s2171_s0 + $0x40] sm:$0x3]  ;;  %v46_v29 = vld [vmem:[%s2171_s0 + $0x3e] sm:$0x3] }
  0x15   :  { %301 = vadd.xlane.f32.xlu2 %v300_v25  ;;  %298 = vadd.xlane.f32.xlu1 %v297_v26  ;;  %v348_v18 = vsel %vm275_vm0, %v171_v15, 0.0  ;;  %v363_v25 = vsel %vm275_vm0, %v176_v22, 0.0  ;;  %v45_v30 = vld [vmem:[%s2171_s0 + $0x3c] sm:$0x3]  ;;  %v179_v31 = vmul.f32 %v1201_v1, %v47_v28  ;;  %v178_v32 = vmul.f32 %v1201_v1, %v46_v29  ;;  %v50_v37 = vld [vmem:[%s2171_s0 + $0x46] sm:$0x3] }
  0x16   :  { %295 = vadd.xlane.f32.xlu0 %v294_v27  ;;  %v360_v26 = vsel %vm275_vm0, %v175_v23, 0.0  ;;  %v357_v27 = vsel %vm275_vm0, %v174_v24, 0.0  ;;  %v177_v33 = vmul.f32 %v1201_v1, %v45_v30  ;;  %v49_v38 = vld [vmem:[%s2171_s0 + $0x44] sm:$0x3]  ;;  %v48_v39 = vld [vmem:[%s2171_s0 + $0x42] sm:$0x3]  ;;  %v182_v40 = vmul.f32 %v1201_v1, %v50_v37 }
  0x17   :  { %v181_v41 = vmul.f32 %v1201_v1, %v49_v38  ;;  %v180_v42 = vmul.f32 %v1201_v1, %v48_v39  ;;  %v53_v46 = vld [vmem:[%s2171_s0 + $0x4c] sm:$0x3]  ;;  %v52_v47 = vld [vmem:[%s2171_s0 + $0x4a] sm:$0x3]  ;;  %v51_v48 = vld [vmem:[%s2171_s0 + $0x48] sm:$0x3]  ;;  %v788_v19 = vlaneseq }
  0x18   :  { %v185_v49 = vmul.f32 %v1201_v1, %v53_v46  ;;  %v184_v50 = vmul.f32 %v1201_v1, %v52_v47  ;;  %v183_v51 = vmul.f32 %v1201_v1, %v51_v48  ;;  %v56_v55 = vld [vmem:[%s2171_s0 + $0x52] sm:$0x3]  ;;  %v55_v56 = vld [vmem:[%s2171_s0 + $0x50] sm:$0x3]  ;;  %v54_v57 = vld [vmem:[%s2171_s0 + $0x4e] sm:$0x3] }
  0x19   :  { %v188_v58 = vmul.f32 %v1201_v1, %v56_v55  ;;  %v187_v59 = vmul.f32 %v1201_v1, %v55_v56  ;;  %v186_v60 = vmul.f32 %v1201_v1, %v54_v57  ;;  %v59_v0 = vld [vmem:[%s2171_s0 + $0x58] sm:$0x3]  ;;  %v58_v2 = vld [vmem:[%s2171_s0 + $0x56] sm:$0x3]  ;;  %v57_v3 = vld [vmem:[%s2171_s0 + $0x54] sm:$0x3] }
  0x1a   :  { %v191_v4 = vmul.f32 %v1201_v1, %v59_v0  ;;  %v190_v5 = vmul.f32 %v1201_v1, %v58_v2  ;;  %v189_v6 = vmul.f32 %v1201_v1, %v57_v3  ;;  %v62_v10 = vld [vmem:[%s2171_s0 + $0x5e] sm:$0x3]  ;;  %v61_v11 = vld [vmem:[%s2171_s0 + $0x5c] sm:$0x3]  ;;  %v60_v12 = vld [vmem:[%s2171_s0 + $0x5a] sm:$0x3] }
  0x1b   :  { %v194_v13 = vmul.f32 %v1201_v1, %v62_v10  ;;  %v193_v14 = vmul.f32 %v1201_v1, %v61_v11  ;;  %v192_v15 = vmul.f32 %v1201_v1, %v60_v12  ;;  %v65_v22 = vld [vmem:[%s2171_s0 + $0x64] sm:$0x3]  ;;  %v64_v24 = vld [vmem:[%s2171_s0 + $0x62] sm:$0x3]  ;;  %vm924_vm4 = vcmask 1044484  }
  0x1c   :  { %v196_v28 = vmul.f32 %v1201_v1, %v64_v24  ;;  %vm926_vm5 = vcmask 1045509   ;;  %vm928_vm6 = vcmask 1046534   ;;  %vm930_vm7 = vcmask 1047559  }
  0x1d   :  { %310 = vadd.xlane.f32.xlu2 %v309_v34  ;;  %307 = vadd.xlane.f32.xlu1 %v306_v35  ;;  %v372_v34 = vsel %vm275_vm0, %v179_v31, 0.0  ;;  %v369_v35 = vsel %vm275_vm0, %v178_v32, 0.0  ;;  %v417_v20 = vsel %vm275_vm0, %v194_v13, 0.0  ;;  %v414_v21 = vsel %vm275_vm0, %v193_v14, 0.0 }
  0x1e   :  { %304 = vadd.xlane.f32.xlu0 %v303_v36  ;;  %v366_v36 = vsel %vm275_vm0, %v177_v33, 0.0  ;;  %v411_v23 = vsel %vm275_vm0, %v192_v15, 0.0  ;;  %v423_v38 = vsel %vm275_vm0, %v196_v28, 0.0  ;;  %vm1104_vm9 = vcmask 1041408  }
  0x25   :  { %319 = vadd.xlane.f32.xlu2 %v318_v43  ;;  %316 = vadd.xlane.f32.xlu1 %v315_v44  ;;  %v381_v43 = vsel %vm275_vm0, %v182_v40, 0.0  ;;  %v378_v44 = vsel %vm275_vm0, %v181_v41, 0.0  ;;  %v68_v41 = vld [vmem:[%s2171_s0 + $0x6a] sm:$0x3] }
  0x26   :  { %313 = vadd.xlane.f32.xlu0 %v312_v45  ;;  %v375_v45 = vsel %vm275_vm0, %v180_v42, 0.0  ;;  %v67_v42 = vld [vmem:[%s2171_s0 + $0x68] sm:$0x3]  ;;  %v200_v47 = vmul.f32 %v1201_v1, %v68_v41 }
  0x27   :  { %v199_v48 = vmul.f32 %v1201_v1, %v67_v42 }
  0x2d   :  { %328 = vadd.xlane.f32.xlu2 %v327_v52  ;;  %325 = vadd.xlane.f32.xlu1 %v324_v53  ;;  %v390_v52 = vsel %vm275_vm0, %v185_v49, 0.0  ;;  %v387_v53 = vsel %vm275_vm0, %v184_v50, 0.0 }
  0x2e   :  { %322 = vadd.xlane.f32.xlu0 %v321_v54  ;;  %v384_v54 = vsel %vm275_vm0, %v183_v51, 0.0 }
  0x35   :  { %337 = vadd.xlane.f32.xlu2 %v336_v61  ;;  %334 = vadd.xlane.f32.xlu1 %v333_v62  ;;  %v399_v61 = vsel %vm275_vm0, %v188_v58, 0.0  ;;  %v396_v62 = vsel %vm275_vm0, %v187_v59, 0.0  ;;  %v435_v58 = vsel %vm275_vm0, %v200_v47, 0.0  ;;  %v432_v59 = vsel %vm275_vm0, %v199_v48, 0.0 }
  0x36   :  { %331 = vadd.xlane.f32.xlu0 %v330_v63  ;;  %v393_v63 = vsel %vm275_vm0, %v186_v60, 0.0 }
  0x3d   :  { %346 = vadd.xlane.f32.xlu2 %v345_v7  ;;  %343 = vadd.xlane.f32.xlu1 %v342_v8  ;;  %v408_v7 = vsel %vm275_vm0, %v191_v4, 0.0  ;;  %v405_v8 = vsel %vm275_vm0, %v190_v5, 0.0 }
  0x3e   :  { %340 = vadd.xlane.f32.xlu0 %v339_v9  ;;  %v402_v9 = vsel %vm275_vm0, %v189_v6, 0.0 }
  0x45   :  { %355 = vadd.xlane.f32.xlu2 %v354_v16  ;;  %352 = vadd.xlane.f32.xlu1 %v351_v17 }
  0x46   :  { %349 = vadd.xlane.f32.xlu0 %v348_v18 }
  0x4d   :  { %364 = vadd.xlane.f32.xlu2 %v363_v25  ;;  %361 = vadd.xlane.f32.xlu1 %v360_v26  ;;  %v63_v25 = vld [vmem:[%s2171_s0 + $0x60] sm:$0x3]  ;;  %v197_v26 = vmul.f32 %v1201_v1, %v65_v22 }
  0x4e   :  { %358 = vadd.xlane.f32.xlu0 %v357_v27  ;;  %v1450_v27 = vand.u32 127, %v788_v19  ;;  %v195_v29 = vmul.f32 %v1201_v1, %v63_v25  ;;  %v72_v19 = vld [vmem:[%s2171_s0 + $0x72] sm:$0x3] }
  0x4f   :  { %v204_v24 = vmul.f32 %v1201_v1, %v72_v19 }
  0x50   :  { %v420_v40 = vsel %vm275_vm0, %v195_v29, 0.0  ;;  %vm1102_vm8 = vcmp.lt.s32.totalorder %v1450_v27, 8 }
  0x55   :  { %373 = vadd.xlane.f32.xlu2 %v372_v34  ;;  %370 = vadd.xlane.f32.xlu1 %v369_v35  ;;  %v426_v34 = vsel %vm275_vm0, %v197_v26, 0.0 }
  0x56   :  { %367 = vadd.xlane.f32.xlu0 %v366_v36 }
  0x5d   :  { %382 = vadd.xlane.f32.xlu2 %v381_v43  ;;  %379 = vadd.xlane.f32.xlu1 %v378_v44 }
  0x5e   :  { %376 = vadd.xlane.f32.xlu0 %v375_v45  ;;  %v66_v45 = vld [vmem:[%s2171_s0 + $0x66] sm:$0x3] }
  0x5f   :  { %v198_v50 = vmul.f32 %v1201_v1, %v66_v45 }
  0x61   :  { %v429_v60 = vsel %vm275_vm0, %v198_v50, 0.0 }
  0x65   :  { %391 = vadd.xlane.f32.xlu2 %v390_v52  ;;  %388 = vadd.xlane.f32.xlu1 %v387_v53 }
  0x66   :  { %385 = vadd.xlane.f32.xlu0 %v384_v54 }
  0x6d   :  { %400 = vadd.xlane.f32.xlu2 %v399_v61  ;;  %397 = vadd.xlane.f32.xlu1 %v396_v62  ;;  %v71_v61 = vld [vmem:[%s2171_s0 + $0x70] sm:$0x3]  ;;  %v70_v62 = vld [vmem:[%s2171_s0 + $0x6e] sm:$0x3] }
  0x6e   :  { %394 = vadd.xlane.f32.xlu0 %v393_v63  ;;  %v69_v63 = vld [vmem:[%s2171_s0 + $0x6c] sm:$0x3]  ;;  %v203_v3 = vmul.f32 %v1201_v1, %v71_v61  ;;  %v202_v4 = vmul.f32 %v1201_v1, %v70_v62 }
  0x6f   :  { %v201_v5 = vmul.f32 %v1201_v1, %v69_v63 }
  0x70   :  { %v444_v13 = vsel %vm275_vm0, %v203_v3, 0.0  ;;  %v441_v14 = vsel %vm275_vm0, %v202_v4, 0.0 }
  0x71   :  { %v438_v15 = vsel %vm275_vm0, %v201_v5, 0.0 }
  0x75   :  { %409 = vadd.xlane.f32.xlu2 %v408_v7  ;;  %406 = vadd.xlane.f32.xlu1 %v405_v8 }
  0x76   :  { %403 = vadd.xlane.f32.xlu0 %v402_v9 }
  0x78   :  { %v290_v16 = vpop.xlane.xlu2 %289  ;;  %v284_v17 = vpop.xlane.xlu1 %283 }
  0x79   :  { %v278_v18 = vpop.xlane.xlu0 %277  ;;  %v792_v32 = vperm.slane %v284_v17, %v1450_v27  ;;  %v794_v39 = vperm.slane %v290_v16, %v1450_v27  ;;  %v74_v16 = vld [vmem:[%s2171_s0 + $0x76] sm:$0x3]  ;;  %v73_v17 = vld [vmem:[%s2171_s0 + $0x74] sm:$0x3] }
  0x7a   :  { %v790_v35 = vperm.slane %v278_v18, %v1450_v27  ;;  %v206_v22 = vmul.f32 %v1201_v1, %v74_v16 }
  0x7d   :  { %418 = vadd.xlane.f32.xlu2 %v417_v20  ;;  %415 = vadd.xlane.f32.xlu1 %v414_v21 }
  0x7e   :  { %412 = vadd.xlane.f32.xlu0 %v411_v23  ;;  %v205_v23 = vmul.f32 %v1201_v1, %v73_v17 }
  0x80   :  { %v293_v30 = vpop.xlane.xlu2 %292  ;;  %v287_v31 = vpop.xlane.xlu1 %286 }
  0x81   :  { %v281_v33 = vpop.xlane.xlu0 %280  ;;  %v793_v36 = vperm.slane %v287_v31, %v1450_v27  ;;  %v795_v43 = vperm.slane %v293_v30, %v1450_v27 }
  0x82   :  { %v791_v37 = vperm.slane %v281_v33, %v1450_v27  ;;  %v450_v33 = vsel %vm275_vm0, %v205_v23, 0.0 }
  0x84   :  { %v919_v44 = vsel %vm918_vm1, %v791_v37, %v790_v35  ;;  %v77_v35 = vld [vmem:[%s2171_s0 + $0x7c] sm:$0x3] }
  0x85   :  { %v921_v46 = vsel %vm920_vm2, %v792_v32, %v919_v44  ;;  %427 = vadd.xlane.f32.xlu2 %v426_v34  ;;  %424 = vadd.xlane.f32.xlu1 %v423_v38  ;;  %v453_v32 = vsel %vm275_vm0, %v206_v22, 0.0  ;;  %v447_v34 = vsel %vm275_vm0, %v204_v24, 0.0  ;;  %v75_v38 = vld [vmem:[%s2171_s0 + $0x78] sm:$0x3] }
  0x86   :  { %421 = vadd.xlane.f32.xlu0 %v420_v40  ;;  %v923_v49 = vsel %vm922_vm3, %v793_v36, %v921_v46  ;;  %v76_v36 = vld [vmem:[%s2171_s0 + $0x7a] sm:$0x3]  ;;  %v209_v40 = vmul.f32 %v1201_v1, %v77_v35 }
  0x87   :  { %v925_v51 = vsel %vm924_vm4, %v794_v39, %v923_v49  ;;  %v208_v41 = vmul.f32 %v1201_v1, %v76_v36 }
  0x88   :  { %v302_v52 = vpop.xlane.xlu2 %301  ;;  %v299_v53 = vpop.xlane.xlu1 %298  ;;  %v927_v54 = vsel %vm926_vm5, %v795_v43, %v925_v51  ;;  %v207_v43 = vmul.f32 %v1201_v1, %v75_v38  ;;  %v462_v50 = vsel %vm275_vm0, %v209_v40, 0.0 }
  0x89   :  { %v797_v55 = vperm.slane %v299_v53, %v1450_v27  ;;  %v296_v56 = vpop.xlane.xlu0 %295  ;;  %v798_v6 = vperm.slane %v302_v52, %v1450_v27  ;;  %v459_v51 = vsel %vm275_vm0, %v208_v41, 0.0 }
  0x8a   :  { %v796_v57 = vperm.slane %v296_v56, %v1450_v27  ;;  %v456_v53 = vsel %vm275_vm0, %v207_v43, 0.0  ;;  %v78_v56 = vld [vmem:[%s2171_s0 + $0x7e] sm:$0x3] }
  0x8c   :  { %v929_v0 = vsel %vm928_vm6, %v796_v57, %v927_v54  ;;  %v80_v54 = vld [vmem:[%s2171_s0 + $0x82] sm:$0x3] }
  0x8d   :  { %436 = vadd.xlane.f32.xlu2 %v435_v58  ;;  %433 = vadd.xlane.f32.xlu1 %v432_v59  ;;  %v1496_v2 = vsel %vm930_vm7, %v797_v55, %v929_v0  ;;  %v79_v55 = vld [vmem:[%s2171_s0 + $0x80] sm:$0x3]  ;;  %v212_v58 = vmul.f32 %v1201_v1, %v80_v54 }
  0x8e   :  { %430 = vadd.xlane.f32.xlu0 %v429_v60  ;;  %v211_v59 = vmul.f32 %v1201_v1, %v79_v55  ;;  %v210_v60 = vmul.f32 %v1201_v1, %v78_v56 }
  0x8f   :  { %v471_v5 = vsel %vm275_vm0, %v212_v58, 0.0 }
  0x90   :  { %v311_v7 = vpop.xlane.xlu2 %310  ;;  %v308_v8 = vpop.xlane.xlu1 %307 }
  0x91   :  { %v800_v9 = vperm.slane %v308_v8, %v1450_v27  ;;  %v305_v10 = vpop.xlane.xlu0 %304  ;;  %v801_v11 = vperm.slane %v311_v7, %v1450_v27  ;;  %v465_v7 = vsel %vm275_vm0, %v210_v60, 0.0  ;;  %v83_v8 = vld [vmem:[%s2171_s0 + $0x88] sm:$0x3] }
  0x92   :  { %v799_v12 = vperm.slane %v305_v10, %v1450_v27 }
  0x94   :  { %v932_v18 = vsel %vm918_vm1, %v799_v12, %v798_v6  ;;  %v468_v6 = vsel %vm275_vm0, %v211_v59, 0.0 }
  0x95   :  { %v933_v20 = vsel %vm920_vm2, %v800_v9, %v932_v18  ;;  %445 = vadd.xlane.f32.xlu2 %v444_v13  ;;  %442 = vadd.xlane.f32.xlu1 %v441_v14  ;;  %v82_v9 = vld [vmem:[%s2171_s0 + $0x86] sm:$0x3]  ;;  %v215_v14 = vmul.f32 %v1201_v1, %v83_v8 }
  0x96   :  { %439 = vadd.xlane.f32.xlu0 %v438_v15  ;;  %v934_v21 = vsel %vm922_vm3, %v801_v11, %v933_v20  ;;  %v81_v11 = vld [vmem:[%s2171_s0 + $0x84] sm:$0x3]  ;;  %v214_v15 = vmul.f32 %v1201_v1, %v82_v9 }
  0x97   :  { %v213_v16 = vmul.f32 %v1201_v1, %v81_v11  ;;  %v480_v23 = vsel %vm275_vm0, %v215_v14, 0.0 }
  0x98   :  { %v320_v25 = vpop.xlane.xlu2 %319  ;;  %v317_v26 = vpop.xlane.xlu1 %316  ;;  %v477_v24 = vsel %vm275_vm0, %v214_v15, 0.0 }
  0x99   :  { %v803_v28 = vperm.slane %v317_v26, %v1450_v27  ;;  %v314_v29 = vpop.xlane.xlu0 %313  ;;  %v804_v30 = vperm.slane %v320_v25, %v1450_v27  ;;  %v474_v25 = vsel %vm275_vm0, %v213_v16, 0.0  ;;  %v86_v26 = vld [vmem:[%s2171_s0 + $0x8e] sm:$0x3] }
  0x9a   :  { %v802_v31 = vperm.slane %v314_v29, %v1450_v27 }
  0x9c   :  { %v935_v37 = vsel %vm924_vm4, %v802_v31, %v934_v21 }
  0x9d   :  { %454 = vadd.xlane.f32.xlu2 %v453_v32  ;;  %451 = vadd.xlane.f32.xlu1 %v450_v33  ;;  %v936_v39 = vsel %vm926_vm5, %v803_v28, %v935_v37  ;;  %v85_v28 = vld [vmem:[%s2171_s0 + $0x8c] sm:$0x3]  ;;  %v218_v32 = vmul.f32 %v1201_v1, %v86_v26 }
  0x9e   :  { %448 = vadd.xlane.f32.xlu0 %v447_v34  ;;  %v937_v42 = vsel %vm928_vm6, %v804_v30, %v936_v39  ;;  %v84_v30 = vld [vmem:[%s2171_s0 + $0x8a] sm:$0x3]  ;;  %v217_v33 = vmul.f32 %v1201_v1, %v85_v28 }
  0x9f   :  { %v216_v35 = vmul.f32 %v1201_v1, %v84_v30 }
  0xa0   :  { %v329_v44 = vpop.xlane.xlu2 %328  ;;  %v326_v45 = vpop.xlane.xlu1 %325  ;;  %v486_v43 = vsel %vm275_vm0, %v217_v33, 0.0 }
  0xa1   :  { %v807_v46 = vperm.slane %v329_v44, %v1450_v27  ;;  %v806_v47 = vperm.slane %v326_v45, %v1450_v27  ;;  %v323_v48 = vpop.xlane.xlu0 %322  ;;  %v483_v44 = vsel %vm275_vm0, %v216_v35, 0.0  ;;  %v89_v45 = vld [vmem:[%s2171_s0 + $0x94] sm:$0x3] }
  0xa2   :  { %v805_v49 = vperm.slane %v323_v48, %v1450_v27  ;;  %v87_v48 = vld [vmem:[%s2171_s0 + $0x90] sm:$0x3] }
  0xa3   :  { %v939_v52 = vsel %vm918_vm1, %v807_v46, %v806_v47  ;;  %v88_v46 = vld [vmem:[%s2171_s0 + $0x92] sm:$0x3] }
  0xa4   :  { %v1561_v57 = vsel %vm930_vm7, %v805_v49, %v937_v42  ;;  %v489_v42 = vsel %vm275_vm0, %v218_v32, 0.0 }
  0xa5   :  { %463 = vadd.xlane.f32.xlu2 %v462_v50  ;;  %460 = vadd.xlane.f32.xlu1 %v459_v51  ;;  %v221_v50 = vmul.f32 %v1201_v1, %v89_v45  ;;  %v220_v51 = vmul.f32 %v1201_v1, %v88_v46 }
  0xa6   :  { %457 = vadd.xlane.f32.xlu0 %v456_v53 }
  0xa7   :  { %v498_v60 = vsel %vm275_vm0, %v221_v50, 0.0 }
  0xa8   :  { %v338_v61 = vpop.xlane.xlu2 %337  ;;  %v335_v62 = vpop.xlane.xlu1 %334 }
  0xa9   :  { %v809_v63 = vperm.slane %v335_v62, %v1450_v27  ;;  %v332_v0 = vpop.xlane.xlu0 %331  ;;  %v810_v3 = vperm.slane %v338_v61, %v1450_v27  ;;  %v495_v61 = vsel %vm275_vm0, %v220_v51, 0.0 }
  0xaa   :  { %v808_v4 = vperm.slane %v332_v0, %v1450_v27  ;;  %v91_v0 = vld [vmem:[%s2171_s0 + $0x98] sm:$0x3] }
  0xac   :  { %v940_v10 = vsel %vm920_vm2, %v808_v4, %v939_v52  ;;  %v219_v52 = vmul.f32 %v1201_v1, %v87_v48  ;;  %v90_v4 = vld [vmem:[%s2171_s0 + $0x96] sm:$0x3] }
  0xad   :  { %v941_v12 = vsel %vm922_vm3, %v809_v63, %v940_v10  ;;  %472 = vadd.xlane.f32.xlu2 %v471_v5  ;;  %469 = vadd.xlane.f32.xlu1 %v468_v6  ;;  %v92_v63 = vld [vmem:[%s2171_s0 + $0x9a] sm:$0x3]  ;;  %v222_v9 = vmul.f32 %v1201_v1, %v90_v4 }
  0xae   :  { %466 = vadd.xlane.f32.xlu0 %v465_v7  ;;  %v942_v13 = vsel %vm924_vm4, %v810_v3, %v941_v12  ;;  %v492_v62 = vsel %vm275_vm0, %v219_v52, 0.0  ;;  %v224_v6 = vmul.f32 %v1201_v1, %v92_v63  ;;  %v223_v7 = vmul.f32 %v1201_v1, %v91_v0 }
  0xb0   :  { %v347_v17 = vpop.xlane.xlu2 %346  ;;  %v344_v18 = vpop.xlane.xlu1 %343  ;;  %v507_v15 = vsel %vm275_vm0, %v224_v6, 0.0  ;;  %v504_v16 = vsel %vm275_vm0, %v223_v7, 0.0 }
  0xb1   :  { %v812_v19 = vperm.slane %v344_v18, %v1450_v27  ;;  %v341_v20 = vpop.xlane.xlu0 %340  ;;  %v813_v21 = vperm.slane %v347_v17, %v1450_v27  ;;  %v501_v17 = vsel %vm275_vm0, %v222_v9, 0.0  ;;  %v95_v18 = vld [vmem:[%s2171_s0 + $0xa0] sm:$0x3] }
  0xb2   :  { %v811_v22 = vperm.slane %v341_v20, %v1450_v27  ;;  %v93_v20 = vld [vmem:[%s2171_s0 + $0x9c] sm:$0x3] }
  0xb4   :  { %v943_v29 = vsel %vm926_vm5, %v811_v22, %v942_v13 }
  0xb5   :  { %481 = vadd.xlane.f32.xlu2 %v480_v23  ;;  %478 = vadd.xlane.f32.xlu1 %v477_v24  ;;  %v944_v31 = vsel %vm928_vm6, %v812_v19, %v943_v29  ;;  %v94_v19 = vld [vmem:[%s2171_s0 + $0x9e] sm:$0x3]  ;;  %v227_v23 = vmul.f32 %v1201_v1, %v95_v18 }
  0xb6   :  { %475 = vadd.xlane.f32.xlu0 %v474_v25  ;;  %v1607_v34 = vsel %vm930_vm7, %v813_v21, %v944_v31  ;;  %v226_v24 = vmul.f32 %v1201_v1, %v94_v19  ;;  %v225_v25 = vmul.f32 %v1201_v1, %v93_v20 }
  0xb7   :  { %v516_v35 = vsel %vm275_vm0, %v227_v23, 0.0 }
  0xb8   :  { %v356_v36 = vpop.xlane.xlu2 %355  ;;  %v353_v37 = vpop.xlane.xlu1 %352 }
  0xb9   :  { %v816_v38 = vperm.slane %v356_v36, %v1450_v27  ;;  %v815_v39 = vperm.slane %v353_v37, %v1450_v27  ;;  %v350_v40 = vpop.xlane.xlu0 %349  ;;  %v513_v36 = vsel %vm275_vm0, %v226_v24, 0.0  ;;  %v510_v37 = vsel %vm275_vm0, %v225_v25, 0.0 }
  0xba   :  { %v814_v41 = vperm.slane %v350_v40, %v1450_v27 }
  0xbc   :  { %v946_v47 = vsel %vm918_vm1, %v815_v39, %v814_v41  ;;  %v97_v39 = vld [vmem:[%s2171_s0 + $0xa4] sm:$0x3]  ;;  %v96_v41 = vld [vmem:[%s2171_s0 + $0xa2] sm:$0x3] }
  0xbd   :  { %490 = vadd.xlane.f32.xlu2 %v489_v42  ;;  %487 = vadd.xlane.f32.xlu1 %v486_v43  ;;  %v947_v49 = vsel %vm920_vm2, %v816_v38, %v946_v47  ;;  %v98_v38 = vld [vmem:[%s2171_s0 + $0xa6] sm:$0x3]  ;;  %v229_v45 = vmul.f32 %v1201_v1, %v97_v39  ;;  %v228_v46 = vmul.f32 %v1201_v1, %v96_v41 }
  0xbe   :  { %484 = vadd.xlane.f32.xlu0 %v483_v44  ;;  %v230_v44 = vmul.f32 %v1201_v1, %v98_v38 }
  0xc0   :  { %v365_v53 = vpop.xlane.xlu2 %364  ;;  %v362_v54 = vpop.xlane.xlu1 %361 }
  0xc1   :  { %v818_v55 = vperm.slane %v362_v54, %v1450_v27  ;;  %v359_v56 = vpop.xlane.xlu0 %358  ;;  %v819_v58 = vperm.slane %v365_v53, %v1450_v27  ;;  %v525_v53 = vsel %vm275_vm0, %v230_v44, 0.0  ;;  %v522_v54 = vsel %vm275_vm0, %v229_v45, 0.0 }
  0xc2   :  { %v817_v59 = vperm.slane %v359_v56, %v1450_v27  ;;  %v101_v56 = vld [vmem:[%s2171_s0 + $0xac] sm:$0x3] }
  0xc4   :  { %v948_v3 = vsel %vm922_vm3, %v817_v59, %v947_v49 }
  0xc5   :  { %v949_v5 = vsel %vm924_vm4, %v818_v55, %v948_v3  ;;  %499 = vadd.xlane.f32.xlu2 %v498_v60  ;;  %496 = vadd.xlane.f32.xlu1 %v495_v61  ;;  %v519_v55 = vsel %vm275_vm0, %v228_v46, 0.0  ;;  %v99_v60 = vld [vmem:[%s2171_s0 + $0xa8] sm:$0x3] }
  0xc6   :  { %493 = vadd.xlane.f32.xlu0 %v492_v62  ;;  %v950_v8 = vsel %vm926_vm5, %v819_v58, %v949_v5  ;;  %v100_v58 = vld [vmem:[%s2171_s0 + $0xaa] sm:$0x3]  ;;  %v233_v62 = vmul.f32 %v1201_v1, %v101_v56  ;;  %v231_v3 = vmul.f32 %v1201_v1, %v99_v60 }
  0xc7   :  { %v232_v63 = vmul.f32 %v1201_v1, %v100_v58 }
  0xc8   :  { %v374_v10 = vpop.xlane.xlu2 %373  ;;  %v371_v11 = vpop.xlane.xlu1 %370 }
  0xc9   :  { %v821_v12 = vperm.slane %v371_v11, %v1450_v27  ;;  %v368_v13 = vpop.xlane.xlu0 %367  ;;  %v822_v26 = vperm.slane %v374_v10, %v1450_v27  ;;  %v534_v10 = vsel %vm275_vm0, %v233_v62, 0.0  ;;  %v531_v11 = vsel %vm275_vm0, %v232_v63, 0.0 }
  0xca   :  { %v820_v14 = vperm.slane %v368_v13, %v1450_v27  ;;  %v528_v13 = vsel %vm275_vm0, %v231_v3, 0.0 }
  0xcc   :  { %v951_v21 = vsel %vm928_vm6, %v820_v14, %v950_v8  ;;  %v104_v14 = vld [vmem:[%s2171_s0 + $0xb2] sm:$0x3] }
  0xcd   :  { %508 = vadd.xlane.f32.xlu2 %v507_v15  ;;  %505 = vadd.xlane.f32.xlu1 %v504_v16  ;;  %v1667_v22 = vsel %vm930_vm7, %v821_v12, %v951_v21  ;;  %v103_v15 = vld [vmem:[%s2171_s0 + $0xb0] sm:$0x3]  ;;  %v102_v16 = vld [vmem:[%s2171_s0 + $0xae] sm:$0x3]  ;;  %v236_v18 = vmul.f32 %v1201_v1, %v104_v14 }
  0xce   :  { %502 = vadd.xlane.f32.xlu0 %v501_v17  ;;  %v235_v19 = vmul.f32 %v1201_v1, %v103_v15  ;;  %v234_v20 = vmul.f32 %v1201_v1, %v102_v16 }
  0xd0   :  { %v383_v28 = vpop.xlane.xlu2 %382  ;;  %v380_v29 = vpop.xlane.xlu1 %379 }
  0xd1   :  { %v824_v30 = vperm.slane %v380_v29, %v1450_v27  ;;  %v377_v31 = vpop.xlane.xlu0 %376  ;;  %v825_v32 = vperm.slane %v383_v28, %v1450_v27  ;;  %v543_v29 = vsel %vm275_vm0, %v236_v18, 0.0 }
  0xd2   :  { %v823_v33 = vperm.slane %v377_v31, %v1450_v27  ;;  %v537_v31 = vsel %vm275_vm0, %v234_v20, 0.0 }
  0xd4   :  { %v953_v40 = vsel %vm918_vm1, %v823_v33, %v822_v26  ;;  %v106_v33 = vld [vmem:[%s2171_s0 + $0xb6] sm:$0x3] }
  0xd5   :  { %v954_v42 = vsel %vm920_vm2, %v824_v30, %v953_v40  ;;  %517 = vadd.xlane.f32.xlu2 %v516_v35  ;;  %514 = vadd.xlane.f32.xlu1 %v513_v36  ;;  %v540_v30 = vsel %vm275_vm0, %v235_v19, 0.0  ;;  %v105_v36 = vld [vmem:[%s2171_s0 + $0xb4] sm:$0x3]  ;;  %v238_v40 = vmul.f32 %v1201_v1, %v106_v33 }
  0xd6   :  { %511 = vadd.xlane.f32.xlu0 %v510_v37  ;;  %v955_v43 = vsel %vm922_vm3, %v825_v32, %v954_v42  ;;  %v107_v32 = vld [vmem:[%s2171_s0 + $0xb8] sm:$0x3]  ;;  %v237_v41 = vmul.f32 %v1201_v1, %v105_v36 }
  0xd7   :  { %v239_v39 = vmul.f32 %v1201_v1, %v107_v32  ;;  %v109_v1 = vld [vmem:[%s2171_s0 + $0xbc] sm:$0x3] }
  0xd8   :  { %v392_v47 = vpop.xlane.xlu2 %391  ;;  %v389_v48 = vpop.xlane.xlu1 %388 }
  0xd9   :  { %v827_v49 = vperm.slane %v389_v48, %v1450_v27  ;;  %v386_v50 = vpop.xlane.xlu0 %385  ;;  %v828_v51 = vperm.slane %v392_v47, %v1450_v27  ;;  %v552_v48 = vsel %vm275_vm0, %v239_v39, 0.0 }
  0xda   :  { %v826_v52 = vperm.slane %v386_v50, %v1450_v27  ;;  %v546_v50 = vsel %vm275_vm0, %v237_v41, 0.0 }
  0xdc   :  { %v956_v59 = vsel %vm924_vm4, %v826_v52, %v955_v43 }
  0xdd   :  { %526 = vadd.xlane.f32.xlu2 %v525_v53  ;;  %523 = vadd.xlane.f32.xlu1 %v522_v54  ;;  %v957_v61 = vsel %vm926_vm5, %v827_v49, %v956_v59  ;;  %v549_v49 = vsel %vm275_vm0, %v238_v40, 0.0  ;;  %v108_v53 = vld [vmem:[%s2171_s0 + $0xba] sm:$0x3] }
  0xde   :  { %520 = vadd.xlane.f32.xlu0 %v519_v55  ;;  %v958_v0 = vsel %vm928_vm6, %v828_v51, %v957_v61  ;;  %v110_v51 = vld [vmem:[%s2171_s0 + $0xbe] sm:$0x3]  ;;  %v1778_v55 = vld [vmem:[%s2173_s2] ss:$0 sm:$0xff] }
  0xdf   :  { %v242_v56 = vmul.f32 %v1778_v55, %v110_v51  ;;  %v241_v58 = vmul.f32 %v1778_v55, %v109_v1  ;;  %v240_v60 = vmul.f32 %v1778_v55, %v108_v53 }
  0xe0   :  { %v401_v4 = vpop.xlane.xlu2 %400  ;;  %v398_v5 = vpop.xlane.xlu1 %397 }
  0xe1   :  { %v831_v6 = vperm.slane %v401_v4, %v1450_v27  ;;  %v830_v7 = vperm.slane %v398_v5, %v1450_v27  ;;  %v395_v8 = vpop.xlane.xlu0 %394  ;;  %v561_v5 = vsel %vm275_vm0, %v242_v56, 0.0 }
  0xe2   :  { %v829_v9 = vperm.slane %v395_v8, %v1450_v27  ;;  %v113_v8 = vld [vmem:[%s2171_s0 + $0xc4] sm:$0x3] }
  0xe3   :  { %v960_v12 = vsel %vm918_vm1, %v831_v6, %v830_v7  ;;  %v558_v6 = vsel %vm275_vm0, %v241_v58, 0.0  ;;  %v555_v7 = vsel %vm275_vm0, %v240_v60, 0.0 }
  0xe4   :  { %v1732_v17 = vsel %vm930_vm7, %v829_v9, %v958_v0  ;;  %v112_v9 = vld [vmem:[%s2171_s0 + $0xc2] sm:$0x3] }
  0xe5   :  { %535 = vadd.xlane.f32.xlu2 %v534_v10  ;;  %532 = vadd.xlane.f32.xlu1 %v531_v11  ;;  %v111_v11 = vld [vmem:[%s2171_s0 + $0xc0] sm:$0x3]  ;;  %v244_v14 = vmul.f32 %v1778_v55, %v112_v9 }
  0xe6   :  { %529 = vadd.xlane.f32.xlu0 %v528_v13  ;;  %v245_v13 = vmul.f32 %v1778_v55, %v113_v8  ;;  %v243_v15 = vmul.f32 %v1778_v55, %v111_v11 }
  0xe8   :  { %v410_v21 = vpop.xlane.xlu2 %409  ;;  %v407_v23 = vpop.xlane.xlu1 %406 }
  0xe9   :  { %v833_v24 = vperm.slane %v407_v23, %v1450_v27  ;;  %v404_v25 = vpop.xlane.xlu0 %403  ;;  %v834_v26 = vperm.slane %v410_v21, %v1450_v27 }
  0xea   :  { %v832_v28 = vperm.slane %v404_v25, %v1450_v27  ;;  %v567_v25 = vsel %vm275_vm0, %v244_v14, 0.0 }
  0xec   :  { %v961_v35 = vsel %vm920_vm2, %v832_v28, %v960_v12  ;;  %v116_v28 = vld [vmem:[%s2171_s0 + $0xca] sm:$0x3] }
  0xed   :  { %v962_v37 = vsel %vm922_vm3, %v833_v24, %v961_v35  ;;  %544 = vadd.xlane.f32.xlu2 %v543_v29  ;;  %541 = vadd.xlane.f32.xlu1 %v540_v30  ;;  %v570_v24 = vsel %vm275_vm0, %v245_v13, 0.0  ;;  %v115_v29 = vld [vmem:[%s2171_s0 + $0xc8] sm:$0x3]  ;;  %v248_v33 = vmul.f32 %v1778_v55, %v116_v28  ;;  %v123_v28 = vld [vmem:[%s2171_s0 + $0xd8] sm:$0x3] }
  0xee   :  { %538 = vadd.xlane.f32.xlu0 %v537_v31  ;;  %v963_v38 = vsel %vm924_vm4, %v834_v26, %v962_v37  ;;  %v564_v26 = vsel %vm275_vm0, %v243_v15, 0.0  ;;  %v114_v31 = vld [vmem:[%s2171_s0 + $0xc6] sm:$0x3]  ;;  %v247_v35 = vmul.f32 %v1778_v55, %v115_v29 }
  0xef   :  { %v246_v37 = vmul.f32 %v1778_v55, %v114_v31 }
  0xf0   :  { %v419_v42 = vpop.xlane.xlu2 %418  ;;  %v416_v43 = vpop.xlane.xlu1 %415 }
  0xf1   :  { %v836_v44 = vperm.slane %v416_v43, %v1450_v27  ;;  %v413_v45 = vpop.xlane.xlu0 %412  ;;  %v837_v46 = vperm.slane %v419_v42, %v1450_v27  ;;  %v579_v43 = vsel %vm275_vm0, %v248_v33, 0.0  ;;  %v255_v33 = vmul.f32 %v1778_v55, %v123_v28 }
  0xf2   :  { %v835_v47 = vperm.slane %v413_v45, %v1450_v27  ;;  %v573_v45 = vsel %vm275_vm0, %v246_v37, 0.0 }
  0xf4   :  { %v964_v52 = vsel %vm926_vm5, %v835_v47, %v963_v38  ;;  %v120_v47 = vld [vmem:[%s2171_s0 + $0xd2] sm:$0x3] }
  0xf5   :  { %553 = vadd.xlane.f32.xlu2 %v552_v48  ;;  %550 = vadd.xlane.f32.xlu1 %v549_v49  ;;  %v965_v54 = vsel %vm928_vm6, %v836_v44, %v964_v52  ;;  %v576_v44 = vsel %vm275_vm0, %v247_v35, 0.0  ;;  %v119_v48 = vld [vmem:[%s2171_s0 + $0xd0] sm:$0x3]  ;;  %v252_v1 = vmul.f32 %v1778_v55, %v120_v47  ;;  %v124_v47 = vld [vmem:[%s2171_s0 + $0xda] sm:$0x3] }
  0xf6   :  { %547 = vadd.xlane.f32.xlu0 %v546_v50  ;;  %v1783_v59 = vsel %vm930_vm7, %v837_v46, %v965_v54  ;;  %v121_v46 = vld [vmem:[%s2171_s0 + $0xd4] sm:$0x3]  ;;  %v251_v52 = vmul.f32 %v1778_v55, %v119_v48 }
  0xf7   :  { %v253_v51 = vmul.f32 %v1778_v55, %v121_v46  ;;  %v129_v46 = vld [vmem:[%s2171_s0 + $0xe4] sm:$0x3] }
  0xf8   :  { %v428_v61 = vpop.xlane.xlu2 %427  ;;  %v425_v62 = vpop.xlane.xlu1 %424 }
  0xf9   :  { %v840_v63 = vperm.slane %v428_v61, %v1450_v27  ;;  %v839_v0 = vperm.slane %v425_v62, %v1450_v27  ;;  %v422_v3 = vpop.xlane.xlu0 %421 }
  0xfa   :  { %v838_v4 = vperm.slane %v422_v3, %v1450_v27  ;;  %v588_v3 = vsel %vm275_vm0, %v251_v52, 0.0 }
  0xfc   :  { %v967_v10 = vsel %vm918_vm1, %v839_v0, %v838_v4  ;;  %v591_v0 = vsel %vm275_vm0, %v252_v1, 0.0  ;;  %v118_v4 = vld [vmem:[%s2171_s0 + $0xce] sm:$0x3]  ;;  %v256_v1 = vmul.f32 %v1778_v55, %v124_v47 }
  0xfd   :  { %562 = vadd.xlane.f32.xlu2 %v561_v5  ;;  %559 = vadd.xlane.f32.xlu1 %v558_v6  ;;  %v968_v12 = vsel %vm920_vm2, %v840_v63, %v967_v10  ;;  %v594_v63 = vsel %vm275_vm0, %v253_v51, 0.0  ;;  %v122_v5 = vld [vmem:[%s2171_s0 + $0xd6] sm:$0x3]  ;;  %v250_v10 = vmul.f32 %v1778_v55, %v118_v4  ;;  %v261_v51 = vmul.f32 %v1778_v55, %v129_v46 }
  0xfe   :  { %556 = vadd.xlane.f32.xlu0 %v555_v7  ;;  %v117_v7 = vld [vmem:[%s2171_s0 + $0xcc] sm:$0x3]  ;;  %v254_v11 = vmul.f32 %v1778_v55, %v122_v5  ;;  %v130_v5 = vld [vmem:[%s2171_s0 + $0xe6] sm:$0x3] }
 0x100   :  { %v437_v16 = vpop.xlane.xlu2 %436  ;;  %v434_v18 = vpop.xlane.xlu1 %433 }
 0x101   :  { %v842_v19 = vperm.slane %v434_v18, %v1450_v27  ;;  %v431_v20 = vpop.xlane.xlu0 %430  ;;  %v843_v21 = vperm.slane %v437_v16, %v1450_v27 }
 0x102   :  { %v841_v23 = vperm.slane %v431_v20, %v1450_v27  ;;  %v585_v20 = vsel %vm275_vm0, %v250_v10, 0.0  ;;  %v262_v10 = vmul.f32 %v1778_v55, %v130_v5 }
 0x104   :  { %v969_v30 = vsel %vm922_vm3, %v841_v23, %v968_v12  ;;  %v249_v12 = vmul.f32 %v1778_v55, %v117_v7 }
 0x105   :  { %v970_v32 = vsel %vm924_vm4, %v842_v19, %v969_v30  ;;  %571 = vadd.xlane.f32.xlu2 %v570_v24  ;;  %568 = vadd.xlane.f32.xlu1 %v567_v25  ;;  %v128_v24 = vld [vmem:[%s2171_s0 + $0xe2] sm:$0x3]  ;;  %v127_v25 = vld [vmem:[%s2171_s0 + $0xe0] sm:$0x3] }
 0x106   :  { %565 = vadd.xlane.f32.xlu0 %v564_v26  ;;  %v971_v36 = vsel %vm926_vm5, %v843_v21, %v970_v32  ;;  %v597_v21 = vsel %vm275_vm0, %v254_v11, 0.0  ;;  %v582_v23 = vsel %vm275_vm0, %v249_v12, 0.0  ;;  %v260_v30 = vmul.f32 %v1778_v55, %v128_v24 }
 0x107   :  { %v259_v31 = vmul.f32 %v1778_v55, %v127_v25  ;;  %v135_v25 = vld [vmem:[%s2171_s0 + $0xf0] sm:$0x3] }
 0x108   :  { %v446_v38 = vpop.xlane.xlu2 %445  ;;  %v443_v39 = vpop.xlane.xlu1 %442 }
 0x109   :  { %v845_v40 = vperm.slane %v443_v39, %v1450_v27  ;;  %v440_v41 = vpop.xlane.xlu0 %439  ;;  %v846_v53 = vperm.slane %v446_v38, %v1450_v27 }
 0x10a   :  { %v844_v42 = vperm.slane %v440_v41, %v1450_v27  ;;  %v615_v41 = vsel %vm275_vm0, %v260_v30, 0.0 }
 0x10c   :  { %v972_v49 = vsel %vm928_vm6, %v844_v42, %v971_v36  ;;  %v612_v42 = vsel %vm275_vm0, %v259_v31, 0.0  ;;  %v267_v31 = vmul.f32 %v1778_v55, %v135_v25 }
 0x10d   :  { %580 = vadd.xlane.f32.xlu2 %v579_v43  ;;  %577 = vadd.xlane.f32.xlu1 %v576_v44  ;;  %v1843_v50 = vsel %vm930_vm7, %v845_v40, %v972_v49  ;;  %v600_v44 = vsel %vm275_vm0, %v255_v33, 0.0 }
 0x10e   :  { %574 = vadd.xlane.f32.xlu0 %v573_v45  ;;  %v125_v45 = vld [vmem:[%s2171_s0 + $0xdc] sm:$0x3] }
 0x10f   :  { %v257_v49 = vmul.f32 %v1778_v55, %v125_v45  ;;  %v137_v45 = vld [vmem:[%s2171_s0 + $0xf4] sm:$0x3] }
 0x110   :  { %v455_v54 = vpop.xlane.xlu2 %454  ;;  %v452_v56 = vpop.xlane.xlu1 %451 }
 0x111   :  { %v848_v58 = vperm.slane %v452_v56, %v1450_v27  ;;  %v449_v60 = vpop.xlane.xlu0 %448  ;;  %v849_v61 = vperm.slane %v455_v54, %v1450_v27 }
 0x112   :  { %v847_v62 = vperm.slane %v449_v60, %v1450_v27 }
 0x114   :  { %v974_v6 = vsel %vm918_vm1, %v847_v62, %v846_v53  ;;  %v618_v62 = vsel %vm275_vm0, %v261_v51, 0.0  ;;  %v269_v51 = vmul.f32 %v1778_v55, %v137_v45 }
 0x115   :  { %v975_v8 = vsel %vm920_vm2, %v848_v58, %v974_v6  ;;  %595 = vadd.xlane.f32.xlu2 %v594_v63  ;;  %592 = vadd.xlane.f32.xlu1 %v591_v0  ;;  %v603_v63 = vsel %vm275_vm0, %v256_v1, 0.0  ;;  %v131_v0 = vld [vmem:[%s2171_s0 + $0xe8] sm:$0x3] }
 0x116   :  { %589 = vadd.xlane.f32.xlu0 %v588_v3  ;;  %v976_v9 = vsel %vm922_vm3, %v849_v61, %v975_v8  ;;  %v606_v61 = vsel %vm275_vm0, %v257_v49, 0.0  ;;  %v126_v3 = vld [vmem:[%s2171_s0 + $0xde] sm:$0x3]  ;;  %v263_v8 = vmul.f32 %v1778_v55, %v131_v0  ;;  %v140_v0 = vld [vmem:[%s2171_s0 + $0xfa] sm:$0x3] }
 0x118   :  { %v464_v13 = vpop.xlane.xlu2 %463  ;;  %v461_v14 = vpop.xlane.xlu1 %460 }
 0x119   :  { %v851_v15 = vperm.slane %v461_v14, %v1450_v27  ;;  %v458_v16 = vpop.xlane.xlu0 %457  ;;  %v852_v18 = vperm.slane %v464_v13, %v1450_v27 }
 0x11a   :  { %v850_v19 = vperm.slane %v458_v16, %v1450_v27 }
 0x11c   :  { %v977_v26 = vsel %vm924_vm4, %v850_v19, %v976_v9  ;;  %v258_v9 = vmul.f32 %v1778_v55, %v126_v3 }
 0x11d   :  { %586 = vadd.xlane.f32.xlu2 %v585_v20  ;;  %598 = vadd.xlane.f32.xlu1 %v597_v21  ;;  %v978_v29 = vsel %vm926_vm5, %v851_v15, %v977_v26  ;;  %v621_v20 = vsel %vm275_vm0, %v262_v10, 0.0  ;;  %v132_v21 = vld [vmem:[%s2171_s0 + $0xea] sm:$0x3] }
 0x11e   :  { %583 = vadd.xlane.f32.xlu0 %v582_v23  ;;  %v979_v32 = vsel %vm928_vm6, %v852_v18, %v978_v29  ;;  %v624_v18 = vsel %vm275_vm0, %v263_v8, 0.0  ;;  %v609_v19 = vsel %vm275_vm0, %v258_v9, 0.0  ;;  %v136_v23 = vld [vmem:[%s2171_s0 + $0xf2] sm:$0x3]  ;;  %v264_v28 = vmul.f32 %v1778_v55, %v132_v21 }
 0x11f   :  { %v268_v29 = vmul.f32 %v1778_v55, %v136_v23 }
 0x120   :  { %v473_v35 = vpop.xlane.xlu2 %472  ;;  %v470_v36 = vpop.xlane.xlu1 %469 }
 0x121   :  { %v855_v37 = vperm.slane %v473_v35, %v1450_v27  ;;  %v854_v38 = vperm.slane %v470_v36, %v1450_v27  ;;  %v467_v39 = vpop.xlane.xlu0 %466 }
 0x122   :  { %v853_v40 = vperm.slane %v467_v39, %v1450_v27  ;;  %v627_v39 = vsel %vm275_vm0, %v264_v28, 0.0 }
 0x123   :  { %v981_v43 = vsel %vm918_vm1, %v855_v37, %v854_v38 }
 0x124   :  { %v1908_v48 = vsel %vm930_vm7, %v853_v40, %v979_v32  ;;  %v639_v40 = vsel %vm275_vm0, %v268_v29, 0.0 }
 0x125   :  { %616 = vadd.xlane.f32.xlu2 %v615_v41  ;;  %613 = vadd.xlane.f32.xlu1 %v612_v42  ;;  %v636_v41 = vsel %vm275_vm0, %v267_v31, 0.0  ;;  %v133_v42 = vld [vmem:[%s2171_s0 + $0xec] sm:$0x3] }
 0x126   :  { %601 = vadd.xlane.f32.xlu0 %v600_v44  ;;  %v265_v47 = vmul.f32 %v1778_v55, %v133_v42 }
 0x128   :  { %v482_v52 = vpop.xlane.xlu2 %481  ;;  %v479_v53 = vpop.xlane.xlu1 %478 }
 0x129   :  { %v857_v54 = vperm.slane %v479_v53, %v1450_v27  ;;  %v476_v56 = vpop.xlane.xlu0 %475  ;;  %v858_v58 = vperm.slane %v482_v52, %v1450_v27 }
 0x12a   :  { %v856_v60 = vperm.slane %v476_v56, %v1450_v27 }
 0x12c   :  { %v982_v4 = vsel %vm920_vm2, %v856_v60, %v981_v43  ;;  %v138_v43 = vld [vmem:[%s2171_s0 + $0xf6] sm:$0x3]  ;;  %v630_v60 = vsel %vm275_vm0, %v265_v47, 0.0 }
 0x12d   :  { %v983_v6 = vsel %vm922_vm3, %v857_v54, %v982_v4  ;;  %607 = vadd.xlane.f32.xlu2 %v606_v61  ;;  %619 = vadd.xlane.f32.xlu1 %v618_v62  ;;  %v270_v49 = vmul.f32 %v1778_v55, %v138_v43  ;;  %v642_v62 = vsel %vm275_vm0, %v269_v51, 0.0  ;;  %v134_v4 = vld [vmem:[%s2171_s0 + $0xee] sm:$0x3] }
 0x12e   :  { %604 = vadd.xlane.f32.xlu0 %v603_v63  ;;  %v984_v7 = vsel %vm924_vm4, %v858_v58, %v983_v6  ;;  %v139_v63 = vld [vmem:[%s2171_s0 + $0xf8] sm:$0x3]  ;;  %v266_v9 = vmul.f32 %v1778_v55, %v134_v4 }
 0x12f   :  { %v645_v61 = vsel %vm275_vm0, %v270_v49, 0.0  ;;  %v271_v6 = vmul.f32 %v1778_v55, %v139_v63 }
 0x130   :  { %v491_v11 = vpop.xlane.xlu2 %490  ;;  %v488_v12 = vpop.xlane.xlu1 %487 }
 0x131   :  { %v860_v13 = vperm.slane %v488_v12, %v1450_v27  ;;  %v485_v14 = vpop.xlane.xlu0 %484  ;;  %v861_v15 = vperm.slane %v491_v11, %v1450_v27 }
 0x132   :  { %v859_v16 = vperm.slane %v485_v14, %v1450_v27 }
 0x134   :  { %v985_v24 = vsel %vm926_vm5, %v859_v16, %v984_v7  ;;  %v272_v7 = vmul.f32 %v1778_v55, %v140_v0 }
 0x135   :  { %625 = vadd.xlane.f32.xlu2 %v624_v18  ;;  %610 = vadd.xlane.f32.xlu1 %v609_v19  ;;  %v986_v26 = vsel %vm928_vm6, %v860_v13, %v985_v24  ;;  %v633_v18 = vsel %vm275_vm0, %v266_v9, 0.0  ;;  %v142_v19 = vld [vmem:[%s2171_s0 + $0xfe] sm:$0x3] }
 0x136   :  { %622 = vadd.xlane.f32.xlu0 %v621_v20  ;;  %v1954_v30 = vsel %vm930_vm7, %v861_v15, %v986_v26  ;;  %v648_v15 = vsel %vm275_vm0, %v271_v6, 0.0  ;;  %v651_v16 = vsel %vm275_vm0, %v272_v7, 0.0  ;;  %v141_v20 = vld [vmem:[%s2171_s0 + $0xfc] sm:$0x3]  ;;  %v274_v24 = vmul.f32 %v1778_v55, %v142_v19 }
 0x137   :  { %v273_v25 = vmul.f32 %v1778_v55, %v141_v20 }
 0x138   :  { %v500_v32 = vpop.xlane.xlu2 %499  ;;  %v497_v33 = vpop.xlane.xlu1 %496 }
 0x139   :  { %v864_v35 = vperm.slane %v500_v32, %v1450_v27  ;;  %v863_v36 = vperm.slane %v497_v33, %v1450_v27  ;;  %v494_v37 = vpop.xlane.xlu0 %493 }
 0x13a   :  { %v862_v38 = vperm.slane %v494_v37, %v1450_v27  ;;  %v654_v37 = vsel %vm275_vm0, %v273_v25, 0.0 }
 0x13c   :  { %v988_v44 = vsel %vm918_vm1, %v863_v36, %v862_v38  ;;  %v657_v36 = vsel %vm275_vm0, %v274_v24, 0.0 }
 0x13d   :  { %628 = vadd.xlane.f32.xlu2 %v627_v39  ;;  %640 = vadd.xlane.f32.xlu1 %v639_v40  ;;  %v989_v46 = vsel %vm920_vm2, %v864_v35, %v988_v44 }
 0x13e   :  { %637 = vadd.xlane.f32.xlu0 %v636_v41 }
 0x140   :  { %v509_v1 = vpop.xlane.xlu2 %508  ;;  %v506_v52 = vpop.xlane.xlu1 %505 }
 0x141   :  { %v866_v53 = vperm.slane %v506_v52, %v1450_v27  ;;  %v503_v54 = vpop.xlane.xlu0 %502  ;;  %v867_v56 = vperm.slane %v509_v1, %v1450_v27 }
 0x142   :  { %v865_v58 = vperm.slane %v503_v54, %v1450_v27 }
 0x144   :  { %v990_v3 = vsel %vm922_vm3, %v865_v58, %v989_v46 }
 0x145   :  { %v991_v5 = vsel %vm924_vm4, %v866_v53, %v990_v3  ;;  %631 = vadd.xlane.f32.xlu1 %v630_v60  ;;  %646 = vadd.xlane.f32.xlu2 %v645_v61 }
 0x146   :  { %643 = vadd.xlane.f32.xlu0 %v642_v62  ;;  %v992_v8 = vsel %vm926_vm5, %v867_v56, %v991_v5 }
 0x148   :  { %v518_v10 = vpop.xlane.xlu2 %517  ;;  %v515_v11 = vpop.xlane.xlu1 %514 }
 0x149   :  { %v869_v12 = vperm.slane %v515_v11, %v1450_v27  ;;  %v512_v13 = vpop.xlane.xlu0 %511  ;;  %v870_v26 = vperm.slane %v518_v10, %v1450_v27  ;;  %v1173_v10 = vmov 0  }
 0x14a   :  { %v868_v14 = vperm.slane %v512_v13, %v1450_v27  ;;  %1139 = vset.pattern.permute.xlu2 %v1173_v10 }
 0x14c   :  { %v993_v21 = vsel %vm928_vm6, %v868_v14, %v992_v8 }
 0x14d   :  { %649 = vadd.xlane.f32.xlu1 %v648_v15  ;;  %652 = vadd.xlane.f32.xlu2 %v651_v16  ;;  %v2011_v23 = vsel %vm930_vm7, %v869_v12, %v993_v21 }
 0x14e   :  { %634 = vadd.xlane.f32.xlu0 %v633_v18 }
 0x150   :  { %v527_v28 = vpop.xlane.xlu2 %526  ;;  %v524_v29 = vpop.xlane.xlu1 %523 }
 0x151   :  { %v872_v31 = vperm.slane %v524_v29, %v1450_v27  ;;  %v521_v32 = vpop.xlane.xlu0 %520  ;;  %v873_v33 = vperm.slane %v527_v28, %v1450_v27 }
 0x152   :  { %v871_v35 = vperm.slane %v521_v32, %v1450_v27 }
 0x154   :  { %v995_v38 = vsel %vm918_vm1, %v871_v35, %v870_v26 }
 0x155   :  { %v996_v39 = vsel %vm920_vm2, %v872_v31, %v995_v38  ;;  %658 = vadd.xlane.f32.xlu1 %v657_v36 }
 0x156   :  { %655 = vadd.xlane.f32.xlu0 %v654_v37  ;;  %v997_v55 = vsel %vm922_vm3, %v873_v33, %v996_v39 }
 0x158   :  { %v533_v40 = vpop.xlane.xlu1 %532  ;;  %v536_v41 = vpop.xlane.xlu2 %535 }
 0x159   :  { %v875_v42 = vperm.slane %v533_v40, %v1450_v27  ;;  %v530_v43 = vpop.xlane.xlu0 %529  ;;  %v876_v44 = vperm.slane %v536_v41, %v1450_v27 }
 0x15a   :  { %v874_v45 = vperm.slane %v530_v43, %v1450_v27 }
 0x15c   :  { %v998_v46 = vsel %vm924_vm4, %v874_v45, %v997_v55 }
 0x15d   :  { %v999_v47 = vsel %vm926_vm5, %v875_v42, %v998_v46 }
 0x15e   :  { %v1000_v49 = vsel %vm928_vm6, %v876_v44, %v999_v47 }
 0x160   :  { %v542_v53 = vpop.xlane.xlu1 %541  ;;  %v545_v54 = vpop.xlane.xlu2 %544 }
 0x161   :  { %v539_v51 = vpop.xlane.xlu0 %538  ;;  %v879_v15 = vperm.slane %v545_v54, %v1450_v27  ;;  %v878_v16 = vperm.slane %v542_v53, %v1450_v27 }
 0x162   :  { %v877_v1 = vperm.slane %v539_v51, %v1450_v27 }
 0x164   :  { %v1001_v52 = vsel %vm930_vm7, %v877_v1, %v1000_v49 }
 0x168   :  { %v551_v58 = vpop.xlane.xlu1 %550  ;;  %v554_v60 = vpop.xlane.xlu2 %553 }
 0x169   :  { %v548_v56 = vpop.xlane.xlu0 %547  ;;  %v881_v21 = vperm.slane %v551_v58, %v1450_v27  ;;  %v882_v24 = vperm.slane %v554_v60, %v1450_v27 }
 0x16a   :  { %v880_v19 = vperm.slane %v548_v56, %v1450_v27 }
 0x170   :  { %v560_v62 = vpop.xlane.xlu1 %559  ;;  %v2033_v63 = vpop.xlane.xlu2 %562 }
 0x171   :  { %v557_v61 = vpop.xlane.xlu0 %556  ;;  %v884_v33 = vperm.slane %v560_v62, %v1450_v27  ;;  %v885_v55 = vperm.slane %v2033_v63, %v1450_v27 }
 0x172   :  { %v883_v26 = vperm.slane %v557_v61, %v1450_v27 }
 0x178   :  { %v569_v3 = vpop.xlane.xlu1 %568  ;;  %v572_v4 = vpop.xlane.xlu2 %571 }
 0x179   :  { %v566_v0 = vpop.xlane.xlu0 %565  ;;  %v887_v28 = vperm.slane %v569_v3, %v1450_v27  ;;  %v888_v35 = vperm.slane %v572_v4, %v1450_v27 }
 0x17a   :  { %v886_v29 = vperm.slane %v566_v0, %v1450_v27 }
 0x17c   :  { %v1009_v37 = vsel %vm918_vm1, %v887_v28, %v886_v29 }
 0x17d   :  { %v1010_v41 = vsel %vm920_vm2, %v888_v35, %v1009_v37 }
 0x17f   :  { %1053 = vxpose.xlu0.b32.start [1/16] (narrow) %v1496_v2, 8 }
 0x180   :  { %v578_v6 = vpop.xlane.xlu1 %577  ;;  %v2038_v7 = vpop.xlane.xlu2 %580 }
 0x181   :  { %v575_v5 = vpop.xlane.xlu0 %574  ;;  %v890_v40 = vperm.slane %v578_v6, %v1450_v27  ;;  %v891_v44 = vperm.slane %v2038_v7, %v1450_v27 }
 0x182   :  { %v889_v38 = vperm.slane %v575_v5, %v1450_v27 }
 0x184   :  { %v1011_v43 = vsel %vm922_vm3, %v889_v38, %v1010_v41 }
 0x185   :  { %v1012_v46 = vsel %vm924_vm4, %v890_v40, %v1011_v43 }
 0x186   :  { %v1013_v54 = vsel %vm926_vm5, %v891_v44, %v1012_v46 }
 0x187   :  { %1054 = vxpose.xlu0.b32.cont [2/16] (narrow) %v1561_v57, 8 }
 0x188   :  { %v2042_v9 = vpop.xlane.xlu1 %592  ;;  %v2045_v2 = vpop.xlane.xlu2 %595 }
 0x189   :  { %v2040_v8 = vpop.xlane.xlu0 %589  ;;  %v895_v51 = vperm.slane %v2042_v9, %v1450_v27  ;;  %v896_v56 = vperm.slane %v2045_v2, %v1450_v27 }
 0x18a   :  { %v894_v1 = vperm.slane %v2040_v8, %v1450_v27 }
 0x18c   :  { %v1016_v61 = vsel %vm918_vm1, %v895_v51, %v894_v1 }
 0x18d   :  { %v1017_v6 = vsel %vm920_vm2, %v896_v56, %v1016_v61 }
 0x18f   :  { %1055 = vxpose.xlu0.b32.cont [3/16] (narrow) %v1607_v34, 8  ;;  %v1085_v34 = vld [vmem:[%s2172_s1] sm:$0x3]  ;;  %s1174_s1 = smov [#allocation2]  }
 0x190   :  { %1088 = vperm.xlu2 %1139, %v1085_v34   ;;  %v587_v11 = vpop.xlane.xlu2 %586  ;;  %s1125_s27 = sshll.u32 %s1174_s1, 4  ;;  %s1126_s27 = int_to_ptr.vmem [resolvable:$true] %s1125_s27 }
 0x191   :  { %v584_v57 = vpop.xlane.xlu0 %583  ;;  %v893_v53 = vperm.slane %v587_v11, %v1450_v27 }
 0x192   :  { %v892_v47 = vperm.slane %v584_v57, %v1450_v27 }
 0x194   :  { %v1014_v60 = vsel %vm928_vm6, %v892_v47, %v1013_v54 }
 0x195   :  { %v1015_v5 = vsel %vm930_vm7, %v893_v53, %v1014_v60 }
 0x197   :  { %1056 = vxpose.xlu0.b32.cont [4/16] (narrow) %v1667_v22, 8  ;;  %v2052_v22 = vpop.xlane.xlu1 %598 }
 0x198   :  { %v897_v62 = vperm.slane %v2052_v22, %v1450_v27 }
 0x199   :  { %v2055_v12 = vpop.xlane.xlu0 %601 }
 0x19a   :  { %v898_v63 = vperm.slane %v2055_v12, %v1450_v27  ;;  %v1018_v7 = vsel %vm922_vm3, %v897_v62, %v1017_v6 }
 0x19c   :  { %v1019_v8 = vsel %vm924_vm4, %v898_v63, %v1018_v7 }
 0x19f   :  { %1057 = vxpose.xlu0.b32.cont [5/16] (narrow) %v1732_v17, 8  ;;  %v2057_v17 = vpop.xlane.xlu1 %613 }
 0x1a0   :  { %v902_v3 = vperm.slane %v2057_v17, %v1450_v27 }
 0x1a1   :  { %v2062_v13 = vpop.xlane.xlu0 %604 }
 0x1a2   :  { %v899_v4 = vperm.slane %v2062_v13, %v1450_v27 }
 0x1a4   :  { %v1020_v22 = vsel %vm926_vm5, %v899_v4, %v1019_v8 }
 0x1a7   :  { %1058 = vxpose.xlu0.b32.cont [6/16] (narrow) %v1783_v59, 8  ;;  %v2060_v59 = vpop.xlane.xlu2 %616  ;;  %v2064_v14 = vpop.xlane.xlu1 %619 }
 0x1a8   :  { %v903_v0 = vperm.slane %v2060_v59, %v1450_v27  ;;  %v904_v2 = vperm.slane %v2064_v14, %v1450_v27 }
 0x1aa   :  { %v1023_v34 = vsel %vm918_vm1, %v903_v0, %v902_v3 }
 0x1ab   :  { %v1024_v59 = vsel %vm920_vm2, %v904_v2, %v1023_v34 }
 0x1af   :  { %1059 = vxpose.xlu0.b32.cont [7/16] (narrow) %v1843_v50, 8  ;;  %v2069_v18 = vpop.xlane.xlu2 %607  ;;  %v2071_v50 = vpop.xlane.xlu0 %622 }
 0x1b0   :  { %v2075_v20 = vpop.xlane.xlu1 %610  ;;  %v900_v9 = vperm.slane %v2069_v18, %v1450_v27  ;;  %v905_v17 = vperm.slane %v2071_v50, %v1450_v27 }
 0x1b1   :  { %v901_v11 = vperm.slane %v2075_v20, %v1450_v27 }
 0x1b2   :  { %v1025_v20 = vsel %vm922_vm3, %v905_v17, %v1024_v59 }
 0x1b7   :  { %1060 = vxpose.xlu0.b32.cont [8/16] (narrow) %v1908_v48, 8  ;;  %v1002_v48 = vsel %vm918_vm1, %v879_v15, %v878_v16  ;;  %v2085_v31 = vpop.xlane.xlu2 %625  ;;  %v638_v32 = vpop.xlane.xlu0 %637  ;;  %v1021_v15 = vsel %vm928_vm6, %v900_v9, %v1020_v22 }
 0x1b8   :  { %v641_v39 = vpop.xlane.xlu1 %640  ;;  %v910_v14 = vperm.slane %v638_v32, %v1450_v27  ;;  %v1022_v18 = vsel %vm930_vm7, %v901_v11, %v1021_v15 }
 0x1b9   :  { %v911_v16 = vperm.slane %v641_v39, %v1450_v27 }
 0x1bf   :  { %1061 = vxpose.xlu0.b32.cont [9/16] (narrow) %v1954_v30, 8  ;;  %v1003_v30 = vsel %vm920_vm2, %v880_v19, %v1002_v48  ;;  %v629_v49 = vpop.xlane.xlu2 %628  ;;  %v906_v19 = vperm.slane %v2085_v31, %v1450_v27 }
 0x1c0   :  { %v1004_v25 = vsel %vm922_vm3, %v881_v21, %v1003_v30  ;;  %v632_v58 = vpop.xlane.xlu1 %631  ;;  %v907_v50 = vperm.slane %v629_v49, %v1450_v27  ;;  %v1030_v30 = vsel %vm918_vm1, %v911_v16, %v910_v14 }
 0x1c1   :  { %v908_v21 = vperm.slane %v632_v58, %v1450_v27 }
 0x1c7   :  { %1062 = vxpose.xlu0.b32.cont [10/16] (narrow) %v2011_v23, 8  ;;  %v1005_v23 = vsel %vm924_vm4, %v882_v24, %v1004_v25  ;;  %v647_v57 = vpop.xlane.xlu2 %646 }
 0x1c8   :  { %v1006_v36 = vsel %vm926_vm5, %v883_v26, %v1005_v23  ;;  %v650_v13 = vpop.xlane.xlu1 %649  ;;  %v913_v24 = vperm.slane %v647_v57, %v1450_v27  ;;  %v1026_v26 = vsel %vm924_vm4, %v906_v19, %v1025_v20 }
 0x1c9   :  { %v1007_v42 = vsel %vm928_vm6, %v884_v33, %v1006_v36  ;;  %v914_v29 = vperm.slane %v650_v13, %v1450_v27  ;;  %v1027_v32 = vsel %vm926_vm5, %v907_v50, %v1026_v26 }
 0x1ca   :  { %v1008_v45 = vsel %vm930_vm7, %v885_v55, %v1007_v42  ;;  %v1028_v23 = vsel %vm928_vm6, %v908_v21, %v1027_v32 }
 0x1cf   :  { %1063 = vxpose.xlu0.b32.cont [11/16] (narrow) %v1001_v52, 8  ;;  %v644_v52 = vpop.xlane.xlu0 %643  ;;  %v653_v31 = vpop.xlane.xlu2 %652 }
 0x1d0   :  { %v912_v48 = vperm.slane %v644_v52, %v1450_v27  ;;  %v915_v36 = vperm.slane %v653_v31, %v1450_v27  ;;  %v659_v55 = vpop.xlane.xlu1 %658 }
 0x1d1   :  { %v917_v41 = vperm.slane %v659_v55, %v1450_v27 }
 0x1d2   :  { %v1031_v28 = vsel %vm920_vm2, %v912_v48, %v1030_v30 }
 0x1d3   :  { %v1032_v35 = vsel %vm922_vm3, %v913_v24, %v1031_v28 }
 0x1d4   :  { %v1033_v38 = vsel %vm924_vm4, %v914_v29, %v1032_v35 }
 0x1d5   :  { %v1034_v40 = vsel %vm926_vm5, %v915_v36, %v1033_v38 }
 0x1d7   :  { %1064 = vxpose.xlu0.b32.cont [12/16] (narrow) %v1008_v45, 8  ;;  %v635_v12 = vpop.xlane.xlu0 %634 }
 0x1d8   :  { %v909_v25 = vperm.slane %v635_v12, %v1450_v27 }
 0x1da   :  { %v1029_v37 = vsel %vm930_vm7, %v909_v25, %v1028_v23 }
 0x1df   :  { %1065 = vxpose.xlu0.b32.cont [13/16] (narrow) %v1015_v5, 8  ;;  %v656_v33 = vpop.xlane.xlu0 %655 }
 0x1e0   :  { %v916_v39 = vperm.slane %v656_v33, %v1450_v27 }
 0x1e2   :  { %v1035_v42 = vsel %vm928_vm6, %v916_v39, %v1034_v40 }
 0x1e3   :  { %v1036_v43 = vsel %vm930_vm7, %v917_v41, %v1035_v42 }
 0x1e7   :  { %1066 = vxpose.xlu0.b32.cont [14/16] (narrow) %v1022_v18, 8 }
 0x1ea   :  { %v1089_v44 = vpop.permute.xlu2 %1088 }
 0x1ef   :  { %1067 = vxpose.xlu0.b32.cont [15/16] (narrow) %v1029_v37, 8 }
 0x1f7   :  { %1068 = vxpose.xlu0.b32.end [16/16] (narrow) %v1036_v43, 8 }
 0x223   :  { %v1069_v45 = vpop.trf.xlu0 }
 0x224   :  { %v1091_v46 = vadd.f32 %v1089_v44, %v1069_v45 }
 0x226   :  { %1096 = vst [vmem:[#allocation2] sm:$0x3] %v1091_v46 }
 0x22d   :  { %v1101_v47 = vld [vmem:[#allocation2] sm:$0x3] }
 0x22e   :  { %v1103_v49 = vsel %vm1102_vm8, %v1101_v47, -inf }
 0x22f   :  { %v1105_v51 = vsel %vm1104_vm9, %v1103_v49, -inf }
 0x230   :  { %1106 = vmax.xlane.f32.xlu1 %v1105_v51 }
 0x25e   :  { %1140 = vset.pattern.permute.xlu0 %v1173_v10 }
 0x2a3   :  { %v1107_v1 = vpop.xlane.xlu1 %1106 }
 0x2a4   :  { %v1108_v52 = vsub.f32 %v1103_v49, %v1107_v1 }
 0x2a6   :  { %v1109_v53 = vmul.f32 1.442695, %v1108_v52 }
 0x2a8   :  { %1142 = vpow2.f32 %v1109_v53 }
 0x2ae   :  { %v1143_v54 = vpop.eup %1142 }
 0x2af   :  { %v1111_v56 = vsel %vm1104_vm9, %v1143_v54, 0.0 }
 0x2b0   :  { %1112 = vadd.xlane.f32.xlu1 %v1111_v56 }
 0x323   :  { %v1113_v58 = vpop.xlane.xlu1 %1112 }
 0x324   :  { %1144 = vrcp.f32 %v1113_v58 }
 0x32a   :  { %v1145_v60 = vpop.eup %1144 }
 0x32b   :  { %v1115_v61 = vmul.f32 %v1145_v60, %v1113_v58 }
 0x32d   :  { %v1116_v62 = vsub.f32 2.0, %v1115_v61 }
 0x32f   :  { %v1117_v27 = vmul.f32 %v1145_v60, %v1116_v62 }
 0x331   :  { %v1118_v10 = vmul.f32 %v1143_v54, %v1117_v27 }
 0x333   :  { %1119 = vst [vmem:[#allocation2] sm:$0x3] %v1118_v10 }
 0x334   :  { %1130 = dma.vmem_to_hbm [thread:$0]  %s1126_s27, 32, %s1128_s30, [#allocation3]  }
 0x335   :  { %1171 = dma.done.wait [#allocation3], 32  }
 0x336   :  { %1172 = vsyncadd [#allocation3], 4294967264 }
 0x337   :  { %1135 = vsyncpa [#allocation3], 1 }

</bundles_post_ra>
